<compile_context>
chip_gen: v5e
topology: v5e:2x2
jax: 0.10.0
libtpu: 0.0.40
codegen_flags: <defaults>
</compile_context>

<pallas_src>
import functools

import jax
import jax.numpy as jnp
import numpy as np
from jax.experimental import pallas as pl
from jax.experimental.pallas import tpu as pltpu

DEPTH = 2  # number of SINR residual blocks (small synthetic setting)


def _round_up(x, m):
  return ((x + m - 1) // m) * m


def sinr_linear_kernel(lonlat_ref, w0_ref, b0_ref, wr_ref, br_ref, wh_ref,
                       feat_ref, emb_ref, *, depth, normalize, matmul_dtype):
  # --- coordinate encoding + input layer as VPU broadcast-FMAs (no concat,
  #     no K=4 MXU pass).  enc order: [sin(pi*lon), sin(pi*lat), cos, cos]. ---
  ll = lonlat_ref[...].astype(jnp.float32)                       # (TB, 2)
  s = jnp.sin(jnp.pi * ll)                                       # (TB, 2)
  c = jnp.cos(jnp.pi * ll)                                       # (TB, 2)
  w0 = w0_ref[...]                                               # (4, H) f32
  x = (s[:, 0:1] * w0[0:1, :] + s[:, 1:2] * w0[1:2, :]
       + c[:, 0:1] * w0[2:3, :] + c[:, 1:2] * w0[3:4, :]) + b0_ref[...]
  x = jnp.maximum(x, 0.0)                                        # (TB, H) f32

  # --- residual MLP blocks (bf16 MXU matmuls, f32 accumulation / adds) ---
  br = br_ref[...].astype(jnp.float32)                           # (2*depth, H)
  for l in range(depth):
    y = jnp.dot(x.astype(matmul_dtype), wr_ref[2 * l],
                preferred_element_type=jnp.float32)
    y = jnp.maximum(y + br[2 * l:2 * l + 1, :], 0.0)
    y = jnp.dot(y.astype(matmul_dtype), wr_ref[2 * l + 1],
                preferred_element_type=jnp.float32)
    y = jnp.maximum(y + br[2 * l + 1:2 * l + 2, :], 0.0)
    x = x + y
  feat_ref[...] = x.astype(feat_ref.dtype)                       # sinr_feat

  # --- bias-free linear head ---
  emb = jnp.dot(x.astype(matmul_dtype), wh_ref[...],
                preferred_element_type=jnp.float32)              # (TB, E) f32
  if normalize:
    # F.normalize(dim=-1, eps=1e-12): x / max(||x||, eps)
    sumsq = jnp.sum(emb * emb, axis=-1, keepdims=True)
    emb = emb * jax.lax.rsqrt(jnp.maximum(sumsq, 1e-24))
  emb_ref[...] = emb.astype(emb_ref.dtype)


def sinr_with_linear(lonlat, params, *, normalize=False, block_b=512,
                     matmul_dtype=jnp.bfloat16):
  w0, b0, wr, br, wh = params
  B = lonlat.shape[0]
  H = w0.shape[1]
  E = wh.shape[1]
  depth = wr.shape[0] // 2

  # Cast the large matmul weights once at the call site (halves weight DMA);
  # f32 accumulation is preserved inside the kernel.
  wr = wr.astype(matmul_dtype)
  wh = wh.astype(matmul_dtype)
  w0 = w0.astype(jnp.float32)
  b0 = b0.astype(jnp.float32)
  br = br.astype(jnp.float32)
  lonlat = lonlat.astype(jnp.float32)

  # Batch tiling (rows per grid step; multiple of 8 for f32 sublanes).
  tb = min(block_b, _round_up(B, 8))
  Bp = _round_up(B, tb)
  if Bp != B:
    lonlat = jnp.pad(lonlat, ((0, Bp - B), (0, 0)))

  kernel = functools.partial(sinr_linear_kernel, depth=depth,
                             normalize=normalize, matmul_dtype=matmul_dtype)

  batch_map = lambda i: (i, 0)
  const2 = lambda i: (0, 0)
  const3 = lambda i: (0, 0, 0)

  feat, emb = pl.pallas_call(
      kernel,
      out_shape=(jax.ShapeDtypeStruct((Bp, H), jnp.float32),
                 jax.ShapeDtypeStruct((Bp, E), jnp.float32)),
      grid_spec=pltpu.PrefetchScalarGridSpec(
          num_scalar_prefetch=0,
          grid=(Bp // tb,),
          in_specs=[
              pl.BlockSpec((tb, 2), batch_map),            # lonlat (tiled)
              pl.BlockSpec((4, H), const2),                # w0  (resident)
              pl.BlockSpec((1, H), const2),                # b0  (resident)
              pl.BlockSpec((2 * depth, H, H), const3),     # wr  (resident)
              pl.BlockSpec((2 * depth, H), const2),        # br  (resident)
              pl.BlockSpec((H, E), const2),                # wh  (resident)
          ],
          out_specs=(pl.BlockSpec((tb, H), batch_map),
                     pl.BlockSpec((tb, E), batch_map)),
      ),
      compiler_params=pltpu.CompilerParams(
          dimension_semantics=("parallel",)),
  )(lonlat, w0, b0, wr, br, wh)

  if Bp != B:
    feat = feat[:B]
    emb = emb[:B]
  return feat, emb


def reference(lonlat, params, *, normalize=False, matmul_dtype=jnp.float32):
  """Pure-JAX reference mirroring the PyTorch forward (same precision policy
  as the kernel when matmul_dtype=bf16)."""
  w0, b0, wr, br, wh = params
  wr = wr.astype(matmul_dtype)
  wh = wh.astype(matmul_dtype)
  s = jnp.sin(jnp.pi * lonlat)
  c = jnp.cos(jnp.pi * lonlat)
  x = (s[:, 0:1] * w0[0:1, :] + s[:, 1:2] * w0[1:2, :]
       + c[:, 0:1] * w0[2:3, :] + c[:, 1:2] * w0[3:4, :]) + b0
  x = jax.nn.relu(x)
  depth = wr.shape[0] // 2
  for l in range(depth):
    y = jnp.dot(x.astype(matmul_dtype), wr[2 * l],
                preferred_element_type=jnp.float32)
    y = jax.nn.relu(y + br[2 * l])
    y = jnp.dot(y.astype(matmul_dtype), wr[2 * l + 1],
                preferred_element_type=jnp.float32)
    y = jax.nn.relu(y + br[2 * l + 1])
    x = x + y
  emb = jnp.dot(x.astype(matmul_dtype), wh, preferred_element_type=jnp.float32)
  if normalize:
    sumsq = jnp.sum(emb * emb, axis=-1, keepdims=True)
    emb = emb * jax.lax.rsqrt(jnp.maximum(sumsq, 1e-24))
  return x, emb


if __name__ == "__main__":
  B, H, E = 8, 256, 256   # batch, sinr feature dim (in_dim), embed_dim
  key = jax.random.PRNGKey(0)
  ks = jax.random.split(key, 7)

  # deterministic synthetic inputs / parameters
  lonlat = jax.random.uniform(ks[0], (B, 2), jnp.float32, -1.0, 1.0)
  w0 = jax.random.normal(ks[1], (4, H), jnp.float32) * 0.5             # Linear(4, H)
  b0 = jax.random.normal(ks[2], (1, H), jnp.float32) * 0.1
  wr = jax.random.normal(ks[3], (2 * DEPTH, H, H), jnp.float32) / np.sqrt(H)
  br = jax.random.normal(ks[4], (2 * DEPTH, H), jnp.float32) * 0.1
  wh = jax.random.normal(ks[5], (H, E), jnp.float32) / np.sqrt(H)       # head (no bias)
  params = (w0, b0, wr, br, wh)

  # 1) pure-f32 matmul path: tight check against f32 reference.
  feat, emb = sinr_with_linear(lonlat, params, normalize=False,
                               matmul_dtype=jnp.float32)
  jax.block_until_ready((feat, emb))
  feat_r, emb_r = reference(lonlat, params, normalize=False,
                            matmul_dtype=jnp.float32)
  np.testing.assert_allclose(np.asarray(feat), np.asarray(feat_r),
                             rtol=1e-4, atol=1e-4)
  np.testing.assert_allclose(np.asarray(emb), np.asarray(emb_r),
                             rtol=1e-4, atol=1e-4)

  # 2) default bf16-matmul path (f32 accumulation): compare against a
  #    reference using the same precision policy.
  feat, emb = sinr_with_linear(lonlat, params, normalize=False)
  jax.block_until_ready((feat, emb))
  feat_r, emb_r = reference(lonlat, params, normalize=False,
                            matmul_dtype=jnp.bfloat16)
  np.testing.assert_allclose(np.asarray(feat), np.asarray(feat_r),
                             rtol=2e-3, atol=2e-3)
  np.testing.assert_allclose(np.asarray(emb), np.asarray(emb_r),
                             rtol=2e-3, atol=2e-3)

  # 3) multi-tile grid (+ batch padding) with normalize=True.
  B2 = 40
  lonlat2 = jax.random.uniform(ks[6], (B2, 2), jnp.float32, -1.0, 1.0)
  feat2, emb2 = sinr_with_linear(lonlat2, params, normalize=True, block_b=16)
  jax.block_until_ready((feat2, emb2))
  feat2_r, emb2_r = reference(lonlat2, params, normalize=True,
                              matmul_dtype=jnp.bfloat16)
  np.testing.assert_allclose(np.asarray(feat2), np.asarray(feat2_r),
                             rtol=2e-3, atol=2e-3)
  np.testing.assert_allclose(np.asarray(emb2), np.asarray(emb2_r),
                             rtol=2e-3, atol=2e-3)

  print("KERNEL_OK")
</pallas_src>

<mosaic_0001>
module attributes {stable_mosaic.version = 11 : i64} {
  func.func @sinr_linear_kernel(%arg0: i32, %arg1: memref<8x2xf32, #tpu.memory_space<vmem>>, %arg2: memref<4x256xf32, #tpu.memory_space<vmem>>, %arg3: memref<1x256xf32, #tpu.memory_space<vmem>>, %arg4: memref<4x256x256xf32, #tpu.memory_space<vmem>>, %arg5: memref<4x256xf32, #tpu.memory_space<vmem>>, %arg6: memref<256x256xf32, #tpu.memory_space<vmem>>, %arg7: memref<8x256xf32, #tpu.memory_space<vmem>>, %arg8: memref<8x256xf32, #tpu.memory_space<vmem>>) attributes {dimension_semantics = [#tpu.dimension_semantics<parallel>], iteration_bounds = array<i64: 1>, scalar_prefetch = 0 : i64, scratch_operands = 0 : i64, tpu.core_type = #tpu.core_type<tc>, window_params = [{transform_indices = @transform_0, window_bounds = array<i64: 8, 2>}, {pipeline_mode = #tpu.pipeline_mode<synchronous>, transform_indices = @transform_1, window_bounds = array<i64: 4, 256>}, {pipeline_mode = #tpu.pipeline_mode<synchronous>, transform_indices = @transform_2, window_bounds = array<i64: 1, 256>}, {pipeline_mode = #tpu.pipeline_mode<synchronous>, transform_indices = @transform_3, window_bounds = array<i64: 4, 256, 256>}, {pipeline_mode = #tpu.pipeline_mode<synchronous>, transform_indices = @transform_4, window_bounds = array<i64: 4, 256>}, {pipeline_mode = #tpu.pipeline_mode<synchronous>, transform_indices = @transform_5, window_bounds = array<i64: 256, 256>}, {transform_indices = @transform_6, window_bounds = array<i64: 8, 256>}, {transform_indices = @transform_7, window_bounds = array<i64: 8, 256>}]} {
    %c0 = arith.constant 0 : index
    %c0_0 = arith.constant 0 : index
    %0 = vector.load %arg1[%c0, %c0_0] : memref<8x2xf32, #tpu.memory_space<vmem>>, vector<8x2xf32>
    %cst = arith.constant 3.14159274 : f32
    %1 = vector.broadcast %cst : f32 to vector<8x2xf32>
    %2 = arith.mulf %1, %0 : vector<8x2xf32>
    %3 = math.sin %2 : vector<8x2xf32>
    %cst_1 = arith.constant 3.14159274 : f32
    %4 = vector.broadcast %cst_1 : f32 to vector<8x2xf32>
    %5 = arith.mulf %4, %0 : vector<8x2xf32>
    %6 = math.cos %5 : vector<8x2xf32>
    %c0_2 = arith.constant 0 : index
    %c0_3 = arith.constant 0 : index
    %7 = vector.load %arg2[%c0_2, %c0_3] : memref<4x256xf32, #tpu.memory_space<vmem>>, vector<4x256xf32>
    %8 = vector.extract_strided_slice %3 {offsets = [0, 0], sizes = [8, 1], strides = [1, 1]} : vector<8x2xf32> to vector<8x1xf32>
    %9 = vector.extract_strided_slice %7 {offsets = [0, 0], sizes = [1, 256], strides = [1, 1]} : vector<4x256xf32> to vector<1x256xf32>
    %10 = vector.broadcast %8 : vector<8x1xf32> to vector<8x256xf32>
    %11 = vector.broadcast %9 : vector<1x256xf32> to vector<8x256xf32>
    %12 = arith.mulf %10, %11 : vector<8x256xf32>
    %13 = vector.extract_strided_slice %3 {offsets = [0, 1], sizes = [8, 1], strides = [1, 1]} : vector<8x2xf32> to vector<8x1xf32>
    %14 = vector.extract_strided_slice %7 {offsets = [1, 0], sizes = [1, 256], strides = [1, 1]} : vector<4x256xf32> to vector<1x256xf32>
    %15 = vector.broadcast %13 : vector<8x1xf32> to vector<8x256xf32>
    %16 = vector.broadcast %14 : vector<1x256xf32> to vector<8x256xf32>
    %17 = arith.mulf %15, %16 : vector<8x256xf32>
    %18 = arith.addf %12, %17 : vector<8x256xf32>
    %19 = vector.extract_strided_slice %6 {offsets = [0, 0], sizes = [8, 1], strides = [1, 1]} : vector<8x2xf32> to vector<8x1xf32>
    %20 = vector.extract_strided_slice %7 {offsets = [2, 0], sizes = [1, 256], strides = [1, 1]} : vector<4x256xf32> to vector<1x256xf32>
    %21 = vector.broadcast %19 : vector<8x1xf32> to vector<8x256xf32>
    %22 = vector.broadcast %20 : vector<1x256xf32> to vector<8x256xf32>
    %23 = arith.mulf %21, %22 : vector<8x256xf32>
    %24 = arith.addf %18, %23 : vector<8x256xf32>
    %25 = vector.extract_strided_slice %6 {offsets = [0, 1], sizes = [8, 1], strides = [1, 1]} : vector<8x2xf32> to vector<8x1xf32>
    %26 = vector.extract_strided_slice %7 {offsets = [3, 0], sizes = [1, 256], strides = [1, 1]} : vector<4x256xf32> to vector<1x256xf32>
    %27 = vector.broadcast %25 : vector<8x1xf32> to vector<8x256xf32>
    %28 = vector.broadcast %26 : vector<1x256xf32> to vector<8x256xf32>
    %29 = arith.mulf %27, %28 : vector<8x256xf32>
    %30 = arith.addf %24, %29 : vector<8x256xf32>
    %c0_4 = arith.constant 0 : index
    %c0_5 = arith.constant 0 : index
    %31 = vector.load %arg3[%c0_4, %c0_5] : memref<1x256xf32, #tpu.memory_space<vmem>>, vector<1x256xf32>
    %32 = vector.broadcast %31 : vector<1x256xf32> to vector<8x256xf32>
    %33 = arith.addf %30, %32 : vector<8x256xf32>
    %cst_6 = arith.constant 0.000000e+00 : f32
    %34 = vector.broadcast %cst_6 : f32 to vector<8x256xf32>
    %35 = arith.maximumf %33, %34 : vector<8x256xf32>
    %c0_7 = arith.constant 0 : index
    %c0_8 = arith.constant 0 : index
    %36 = vector.load %arg5[%c0_7, %c0_8] : memref<4x256xf32, #tpu.memory_space<vmem>>, vector<4x256xf32>
    %c0_9 = arith.constant 0 : index
    %c0_10 = arith.constant 0 : index
    %c0_11 = arith.constant 0 : index
    %37 = vector.load %arg4[%c0_9, %c0_10, %c0_11] : memref<4x256x256xf32, #tpu.memory_space<vmem>>, vector<1x256x256xf32>
    %38 = vector.shape_cast %37 : vector<1x256x256xf32> to vector<256x256xf32>
    %cst_12 = arith.constant dense<0.000000e+00> : vector<8x256xf32>
    %39 = tpu.matmul %35, %38, %cst_12 {dimension_numbers = #tpu.dot_dimension_numbers<[1], [0], [0], [1], [0, 0, 1, 1], [], []>} : vector<8x256xf32>, vector<256x256xf32>, vector<8x256xf32> -> vector<8x256xf32>
    %40 = vector.extract_strided_slice %36 {offsets = [0, 0], sizes = [1, 256], strides = [1, 1]} : vector<4x256xf32> to vector<1x256xf32>
    %41 = vector.broadcast %40 : vector<1x256xf32> to vector<8x256xf32>
    %42 = arith.addf %39, %41 : vector<8x256xf32>
    %cst_13 = arith.constant 0.000000e+00 : f32
    %43 = vector.broadcast %cst_13 : f32 to vector<8x256xf32>
    %44 = arith.maximumf %42, %43 : vector<8x256xf32>
    %c1 = arith.constant 1 : index
    %c0_14 = arith.constant 0 : index
    %c0_15 = arith.constant 0 : index
    %45 = vector.load %arg4[%c1, %c0_14, %c0_15] : memref<4x256x256xf32, #tpu.memory_space<vmem>>, vector<1x256x256xf32>
    %46 = vector.shape_cast %45 : vector<1x256x256xf32> to vector<256x256xf32>
    %cst_16 = arith.constant dense<0.000000e+00> : vector<8x256xf32>
    %47 = tpu.matmul %44, %46, %cst_16 {dimension_numbers = #tpu.dot_dimension_numbers<[1], [0], [0], [1], [0, 0, 1, 1], [], []>} : vector<8x256xf32>, vector<256x256xf32>, vector<8x256xf32> -> vector<8x256xf32>
    %48 = vector.extract_strided_slice %36 {offsets = [1, 0], sizes = [1, 256], strides = [1, 1]} : vector<4x256xf32> to vector<1x256xf32>
    %49 = vector.broadcast %48 : vector<1x256xf32> to vector<8x256xf32>
    %50 = arith.addf %47, %49 : vector<8x256xf32>
    %cst_17 = arith.constant 0.000000e+00 : f32
    %51 = vector.broadcast %cst_17 : f32 to vector<8x256xf32>
    %52 = arith.maximumf %50, %51 : vector<8x256xf32>
    %53 = arith.addf %35, %52 : vector<8x256xf32>
    %c2 = arith.constant 2 : index
    %c0_18 = arith.constant 0 : index
    %c0_19 = arith.constant 0 : index
    %54 = vector.load %arg4[%c2, %c0_18, %c0_19] : memref<4x256x256xf32, #tpu.memory_space<vmem>>, vector<1x256x256xf32>
    %55 = vector.shape_cast %54 : vector<1x256x256xf32> to vector<256x256xf32>
    %cst_20 = arith.constant dense<0.000000e+00> : vector<8x256xf32>
    %56 = tpu.matmul %53, %55, %cst_20 {dimension_numbers = #tpu.dot_dimension_numbers<[1], [0], [0], [1], [0, 0, 1, 1], [], []>} : vector<8x256xf32>, vector<256x256xf32>, vector<8x256xf32> -> vector<8x256xf32>
    %57 = vector.extract_strided_slice %36 {offsets = [2, 0], sizes = [1, 256], strides = [1, 1]} : vector<4x256xf32> to vector<1x256xf32>
    %58 = vector.broadcast %57 : vector<1x256xf32> to vector<8x256xf32>
    %59 = arith.addf %56, %58 : vector<8x256xf32>
    %cst_21 = arith.constant 0.000000e+00 : f32
    %60 = vector.broadcast %cst_21 : f32 to vector<8x256xf32>
    %61 = arith.maximumf %59, %60 : vector<8x256xf32>
    %c3 = arith.constant 3 : index
    %c0_22 = arith.constant 0 : index
    %c0_23 = arith.constant 0 : index
    %62 = vector.load %arg4[%c3, %c0_22, %c0_23] : memref<4x256x256xf32, #tpu.memory_space<vmem>>, vector<1x256x256xf32>
    %63 = vector.shape_cast %62 : vector<1x256x256xf32> to vector<256x256xf32>
    %cst_24 = arith.constant dense<0.000000e+00> : vector<8x256xf32>
    %64 = tpu.matmul %61, %63, %cst_24 {dimension_numbers = #tpu.dot_dimension_numbers<[1], [0], [0], [1], [0, 0, 1, 1], [], []>} : vector<8x256xf32>, vector<256x256xf32>, vector<8x256xf32> -> vector<8x256xf32>
    %65 = vector.extract_strided_slice %36 {offsets = [3, 0], sizes = [1, 256], strides = [1, 1]} : vector<4x256xf32> to vector<1x256xf32>
    %66 = vector.broadcast %65 : vector<1x256xf32> to vector<8x256xf32>
    %67 = arith.addf %64, %66 : vector<8x256xf32>
    %cst_25 = arith.constant 0.000000e+00 : f32
    %68 = vector.broadcast %cst_25 : f32 to vector<8x256xf32>
    %69 = arith.maximumf %67, %68 : vector<8x256xf32>
    %70 = arith.addf %53, %69 : vector<8x256xf32>
    %c0_26 = arith.constant 0 : index
    %c0_27 = arith.constant 0 : index
    %71 = vector.load %arg7[%c0_26, %c0_27] : memref<8x256xf32, #tpu.memory_space<vmem>>, vector<8x256xf32>
    tpu.vector_store %arg7[%c0_26, %c0_27], %70 {strides = array<i32>} : memref<8x256xf32, #tpu.memory_space<vmem>>, vector<8x256xf32>,
    %c0_28 = arith.constant 0 : index
    %c0_29 = arith.constant 0 : index
    %72 = vector.load %arg6[%c0_28, %c0_29] : memref<256x256xf32, #tpu.memory_space<vmem>>, vector<256x256xf32>
    %cst_30 = arith.constant dense<0.000000e+00> : vector<8x256xf32>
    %73 = tpu.matmul %70, %72, %cst_30 {dimension_numbers = #tpu.dot_dimension_numbers<[1], [0], [0], [1], [0, 0, 1, 1], [], []>} : vector<8x256xf32>, vector<256x256xf32>, vector<8x256xf32> -> vector<8x256xf32>
    %c0_31 = arith.constant 0 : index
    %c0_32 = arith.constant 0 : index
    %74 = vector.load %arg8[%c0_31, %c0_32] : memref<8x256xf32, #tpu.memory_space<vmem>>, vector<8x256xf32>
    tpu.vector_store %arg8[%c0_31, %c0_32], %73 {strides = array<i32>} : memref<8x256xf32, #tpu.memory_space<vmem>>, vector<8x256xf32>,
    return
  }
  func.func @transform_0(%arg0: i32) -> (i32, i32) {
    %c0_i32 = arith.constant 0 : i32
    %c0_i32_0 = arith.constant 0 : i32
    return %arg0, %c0_i32 : i32, i32
  }
  func.func @transform_1(%arg0: i32) -> (i32, i32) {
    %c0_i32 = arith.constant 0 : i32
    %c0_i32_0 = arith.constant 0 : i32
    %c0_i32_1 = arith.constant 0 : i32
    return %c0_i32, %c0_i32_0 : i32, i32
  }
  func.func @transform_2(%arg0: i32) -> (i32, i32) {
    %c0_i32 = arith.constant 0 : i32
    %c0_i32_0 = arith.constant 0 : i32
    %c0_i32_1 = arith.constant 0 : i32
    return %c0_i32, %c0_i32_0 : i32, i32
  }
  func.func @transform_3(%arg0: i32) -> (i32, i32, i32) {
    %c0_i32 = arith.constant 0 : i32
    %c0_i32_0 = arith.constant 0 : i32
    %c0_i32_1 = arith.constant 0 : i32
    %c0_i32_2 = arith.constant 0 : i32
    return %c0_i32, %c0_i32_0, %c0_i32_1 : i32, i32, i32
  }
  func.func @transform_4(%arg0: i32) -> (i32, i32) {
    %c0_i32 = arith.constant 0 : i32
    %c0_i32_0 = arith.constant 0 : i32
    %c0_i32_1 = arith.constant 0 : i32
    return %c0_i32, %c0_i32_0 : i32, i32
  }
  func.func @transform_5(%arg0: i32) -> (i32, i32) {
    %c0_i32 = arith.constant 0 : i32
    %c0_i32_0 = arith.constant 0 : i32
    %c0_i32_1 = arith.constant 0 : i32
    return %c0_i32, %c0_i32_0 : i32, i32
  }
  func.func @transform_6(%arg0: i32) -> (i32, i32) {
    %c0_i32 = arith.constant 0 : i32
    %c0_i32_0 = arith.constant 0 : i32
    return %arg0, %c0_i32 : i32, i32
  }
  func.func @transform_7(%arg0: i32) -> (i32, i32) {
    %c0_i32 = arith.constant 0 : i32
    %c0_i32_0 = arith.constant 0 : i32
    return %arg0, %c0_i32 : i32, i32
  }
}

</mosaic_0001>

<bundles_post_ra>
// kernel: tpu_custom_call.1
= control target key start
LH: loop header
LB: loop body
LE: loop exit
PB: predicated region body
PF: predicated region fallthrough
CT: control target
= control target key end

     0   :  { %13 = vsyncpa [#allocation3], 0  ;;  %s1576_s0 = inlined_call_operand.vmem [shape: f32[8,2], index: 0, kind: input, shape index: {}]   ;;  %s1577_s1 = inlined_call_operand.vmem [shape: f32[4,256], index: 1, kind: input, shape index: {}]   ;;  %s1578_s2 = inlined_call_operand.vmem [shape: f32[1,256], index: 2, kind: input, shape index: {}]   ;;  %s1579_s3 = inlined_call_operand.hbm [shape: f32[4,256,256], index: 3, kind: input, shape index: {}]   ;;  %s1580_s4 = inlined_call_operand.hbm [shape: f32[4,256], index: 4, kind: input, shape index: {}]   ;;  %s1581_s5 = inlined_call_operand.hbm [shape: f32[256,256], index: 5, kind: input, shape index: {}]   ;;  %s1582_s6 = inlined_call_operand.hbm [shape: f32[8,256], index: 6, kind: output, shape index: {0}]   ;;  %s1583_s7 = inlined_call_operand.hbm [shape: f32[8,256], index: 7, kind: output, shape index: {1}]  }
   0x1   :  { %14 = vsyncpa [#allocation6], 0 }
   0x2   :  { %15 = vsyncpa [#allocation4], 0  ;;  %s41_s26 = sshll.u32 %s1580_s4, 4  ;;  %s42_s26 = int_to_ptr.hbm [resolvable:$true] %s41_s26 }
   0x3   :  { %16 = vsyncpa [#allocation10], 0  ;;  %s1403_s27 = smov [#allocation5]   ;;  %s27_s8 = sshll.u32 %s1579_s3, 4  ;;  %s28_s8 = int_to_ptr.hbm [resolvable:$true] %s27_s8 }
   0x4   :  { %s43_s28 = sshll.u32 %s1403_s27, 4  ;;  %s1404_s9 = smov [#allocation2]   ;;  %s44_s28 = int_to_ptr.vmem [resolvable:$true] %s43_s28 }
   0x5   :  { %46 = dma.hbm_to_vmem [thread:$0]  %s42_s26, 128, %s44_s28, [#allocation6]  }
   0x6   :  { %s29_s10 = sshll.u32 %s1404_s9, 4  ;;  %s1405_s11 = smov 256   ;;  %s30_s10 = int_to_ptr.vmem [resolvable:$true] %s29_s10 }
   0x7   :  { %s1406_s12 = smov 16   ;;  %s51_s4 = sshll.u32 %s1581_s5, 4  ;;  %s52_s4 = int_to_ptr.hbm [resolvable:$true] %s51_s4 }
   0x8   :  { %35 = dma.hbm_to_vmem [thread:$0]  %s28_s8, 32768, %s30_s10, [#allocation3], %s1405_s11, %s1405_s11, %s1406_s12  }
   0x9   :  { %s1407_s15 = smov [#allocation7]  }
   0xa   :  { %s53_s16 = sshll.u32 %s1407_s15, 4  ;;  %s54_s16 = int_to_ptr.vmem [resolvable:$true] %s53_s16 }
   0xb   :  { %59 = dma.hbm_to_vmem [thread:$0]  %s52_s4, 8192, %s54_s16, [#allocation6], %s1405_s11, %s1405_s11, %s1406_s12  }
   0xc   :  { %1395 = dma.done.wait [#allocation3], 32768  }
   0xd   :  { %1396 = vsyncadd [#allocation3], 4294934528 }
   0xe   :  { %1397 = dma.done.wait [#allocation6], 8320  }
   0xf   :  { %1398 = vsyncadd [#allocation6], 4294958976  ;;  %v1408_v0 = vmov 0   ;;  %v72_v1 = vld [vmem:[%s1576_s0] sm:$0xff]  ;;  %v1409_v14 = vmov 683565275  }
  0x10   :  { %1271 = vset.pattern.permute.xlu0 %v1408_v0  ;;  %1273 = vset.pattern.permute.xlu1 %v1408_v0  ;;  %v1472_v2 = vmul.f32 3.1415927, %v72_v1  ;;  %v1410_v16 = vmov 2475754826   ;;  %v1411_v18 = vmov 2131351028  }
  0x11   :  { %v1412_v20 = vmov 2102212464   ;;  %v1413_v22 = vmov 920167782   ;;  %v1414_v28 = vmov 1326507024  }
  0x12   :  { %v77_v3 = vand.u32 2139095040, %v1472_v2  ;;  %v74_v5 = vand.u32 2147483647, %v1472_v2  ;;  %vm76_vm12 = vcmp.lt.s32.totalorder %v1472_v2, 0  ;;  %s1223_s22 = sshll.u32 %s1582_s6, 4  ;;  %s1417_s23 = smov [#allocation9]   ;;  %s1224_s22 = int_to_ptr.hbm [resolvable:$true] %s1223_s22 }
  0x13   :  { %s1232_s24 = sshll.u32 %s1417_s23, 4  ;;  %s1234_s27 = sshll.u32 %s1583_s7, 4  ;;  %s1233_s24 = int_to_ptr.vmem [resolvable:$true] %s1232_s24  ;;  %s1235_s27 = int_to_ptr.hbm [resolvable:$true] %s1234_s27 }
  0x14   :  { %v78_v4 = vshrl.u32 %v77_v3, 23  ;;  %v81_v8 = vand.u32 8388607, %v74_v5  ;;  %vm1520_vm13 = vcmp.le.f32.partialorder %v74_v5, 0.7853982  ;;  %v481_v5 = vld [vmem:[#allocation2 + $0xe8] sm:$0xff] }
  0x16   :  { %v1250_v6 = vadd.s32 4294967169, %v78_v4  ;;  %v82_v11 = vor.u32 8388608, %v81_v8 }
  0x18   :  { %v84_v7 = vadd.s32 1, %v1250_v6  ;;  %v1481_v30 = vshll.u32 %v82_v11, 8 }
  0x1a   :  { %vm85_vm0 = vcmp.gt.s32.totalorder %v84_v7, 0  ;;  %v123_v42 = vand.u32 65535, %v1481_v30  ;;  %v124_v43 = vshrl.u32 %v1481_v30, 16 }
  0x1b   :  { %v86_v9 = vsel %vm85_vm0, %v84_v7, 0 }
  0x1c   :  { %v88_v10 = vand.u32 31, %v86_v9  ;;  %v1478_v12 = vshrl.u32 %v86_v9, 5 }
  0x1e   :  { %v89_v13 = vsub.s32 32, %v88_v10  ;;  %v91_v15 = vshll.u32 %v1409_v14, %v88_v10  ;;  %v94_v17 = vshll.u32 %v1410_v16, %v88_v10  ;;  %v97_v19 = vshll.u32 %v1411_v18, %v88_v10 }
  0x1f   :  { %v100_v21 = vshll.u32 %v1412_v20, %v88_v10  ;;  %v103_v23 = vshll.u32 %v1413_v22, %v88_v10  ;;  %vm106_vm1 = vcmp.lt.s32.totalorder %v1478_v12, 1  ;;  %vm109_vm2 = vcmp.lt.s32.totalorder %v1478_v12, 4 }
  0x20   :  { %v92_v24 = vshrl.u32 %v1410_v16, %v89_v13  ;;  %v95_v25 = vshrl.u32 %v1411_v18, %v89_v13  ;;  %v98_v26 = vshrl.u32 %v1412_v20, %v89_v13  ;;  %v101_v27 = vshrl.u32 %v1413_v22, %v89_v13 }
  0x21   :  { %v104_v29 = vshrl.u32 %v1414_v28, %v89_v13  ;;  %vm108_vm3 = vcmp.lt.s32.totalorder %v1478_v12, 3  ;;  %vm107_vm4 = vcmp.lt.s32.totalorder %v1478_v12, 2  ;;  %v90_v50 = vshrl.u32 %v1409_v14, %v89_v13 }
  0x22   :  { %v93_v31 = vor.u32 %v92_v24, %v91_v15  ;;  %v96_v32 = vor.u32 %v95_v25, %v94_v17  ;;  %v99_v33 = vor.u32 %v98_v26, %v97_v19  ;;  %v102_v34 = vor.u32 %v101_v27, %v100_v21 }
  0x23   :  { %v105_v35 = vor.u32 %v104_v29, %v103_v23 }
  0x24   :  { %v114_v36 = vsel %vm106_vm1, %v93_v31, %v96_v32  ;;  %v118_v37 = vsel %vm106_vm1, %v96_v32, %v99_v33  ;;  %v115_v38 = vsel %vm109_vm2, %v102_v34, 920167782  ;;  %v110_v63 = vsel %vm106_vm1, %v90_v50, %v93_v31  ;;  %v469_v50 = vld [vmem:[#allocation2 + $0x88] sm:$0xff] }
  0x25   :  { %v119_v39 = vsel %vm109_vm2, %v105_v35, 1326507024  ;;  %v116_v40 = vsel %vm108_vm3, %v99_v33, %v115_v38  ;;  %v111_v3 = vsel %vm109_vm2, %v99_v33, 2102212464 }
  0x26   :  { %v120_v41 = vsel %vm108_vm3, %v102_v34, %v119_v39  ;;  %v117_v44 = vsel %vm107_vm4, %v114_v36, %v116_v40  ;;  %v112_v14 = vsel %vm108_vm3, %v96_v32, %v111_v3  ;;  %v510_v3 = vld [vmem:[#allocation2 + $0x1d0] sm:$0xff] }
  0x27   :  { %v121_v45 = vsel %vm107_vm4, %v118_v37, %v120_v41  ;;  %v147_v48 = vand.u32 65535, %v117_v44  ;;  %v148_v49 = vshrl.u32 %v117_v44, 16  ;;  %v113_v22 = vsel %vm107_vm4, %v110_v63, %v112_v14  ;;  %v478_v63 = vld [vmem:[#allocation2 + $0xd0] sm:$0xff] }
  0x28   :  { %v125_v46 = vand.u32 65535, %v121_v45  ;;  %v126_v47 = vshrl.u32 %v121_v45, 16  ;;  %v167_v26 = vmul.u32 %v1481_v30, %v113_v22  ;;  %vm217_vm4 = vweird.f32 %v1472_v2 }
  0x29   :  { %v149_v54 = vmul.u32 %v147_v48, %v123_v42  ;;  %v150_v55 = vmul.u32 %v148_v49, %v123_v42  ;;  %v151_v56 = vmul.u32 %v147_v48, %v124_v43  ;;  %v152_v60 = vmul.u32 %v148_v49, %v124_v43 }
  0x2a   :  { %v127_v51 = vmul.u32 %v125_v46, %v123_v42  ;;  %v128_v52 = vmul.u32 %v126_v47, %v123_v42  ;;  %v129_v53 = vmul.u32 %v125_v46, %v124_v43  ;;  %v130_v57 = vmul.u32 %v126_v47, %v124_v43 }
  0x2b   :  { %v153_v61 = vshll.u32 %v150_v55, 16  ;;  %v155_v62 = vshll.u32 %v151_v56, 16  ;;  %v154_v11 = vshrl.u32 %v150_v55, 16  ;;  %v156_v18 = vshrl.u32 %v151_v56, 16  ;;  %v514_v55 = vld [vmem:[#allocation2 + $0x1f0] sm:$0xff]  ;;  %v483_v56 = vld [vmem:[#allocation2 + $0xf8] sm:$0xff] }
  0x2c   :  { %v131_v58 = vshll.u32 %v128_v52, 16  ;;  %v133_v59 = vshll.u32 %v129_v53, 16  ;;  %v132_v7 = vshrl.u32 %v128_v52, 16  ;;  %v134_v15 = vshrl.u32 %v129_v53, 16  ;;  %543 = vmatpush.msra.mxu1 %v514_v55  ;;  %563 = vmatpush.msra.mxu2 %v483_v56  ;;  %v499_v55 = vld [vmem:[#allocation2 + $0x178] sm:$0xff]  ;;  %v464_v56 = vld [vmem:[#allocation2 + $0x60] sm:$0xff] }
  0x2d   :  { %vm157_vm6 = vc.u32 %v149_v54, %v153_v61  ;;  %v159_v6 = vadd.s32 %v153_v61, %v149_v54  ;;  %v482_v54 = vld [vmem:[#allocation2 + $0xf0] sm:$0xff] }
  0x2e   :  { %vm135_vm5 = vc.u32 %v127_v51, %v131_v58  ;;  %v137_v1 = vadd.s32 %v131_v58, %v127_v51  ;;  %v158_v9 = vsel %vm157_vm6, 1, %v1408_v0  ;;  %523 = vmatpush.msra.mxu0 %v482_v54  ;;  %v515_v58 = vld [vmem:[#allocation2 + $0x1f8] sm:$0xff]  ;;  %564 = vmatpush.msra.mxu2 %v481_v5 }
  0x2f   :  { %v136_v4 = vsel %vm135_vm5, 1, %v1408_v0  ;;  %v160_v13 = vadd.s32 %v158_v9, %v152_v60  ;;  %vm161_vm8 = vc.u32 %v159_v6, %v155_v62  ;;  %v163_v21 = vadd.s32 %v159_v6, %v155_v62  ;;  %v512_v60 = vld [vmem:[#allocation2 + $0x1e0] sm:$0xff]  ;;  %583 = vmatpush.msra.mxu3 %v515_v58  ;;  %v513_v62 = vld [vmem:[#allocation2 + $0x1e8] sm:$0xff]  ;;  %v511_v6 = vld [vmem:[#allocation2 + $0x1d8] sm:$0xff] }
  0x30   :  { %v138_v8 = vadd.s32 %v136_v4, %v130_v57  ;;  %vm139_vm7 = vc.u32 %v137_v1, %v133_v59  ;;  %v162_v17 = vsel %vm161_vm8, 1, %v1408_v0  ;;  %v480_v59 = vld [vmem:[#allocation2 + $0xe0] sm:$0xff]  ;;  %544 = vmatpush.msra.mxu1 %v512_v60  ;;  %v479_v4 = vld [vmem:[#allocation2 + $0xd8] sm:$0xff]  ;;  %v465_v58 = vld [vmem:[#allocation2 + $0x68] sm:$0xff] }
  0x31   :  { %v140_v10 = vsel %vm139_vm7, 1, %v1408_v0  ;;  %v164_v19 = vadd.s32 %v162_v17, %v160_v13  ;;  %524 = vmatpush.msra.mxu0 %v480_v59  ;;  %584 = vmatpush.msra.mxu3 %v513_v62  ;;  %v476_v9 = vld [vmem:[#allocation2 + $0xc0] sm:$0xff]  ;;  %v509_v13 = vld [vmem:[#allocation2 + $0x1c8] sm:$0xff]  ;;  %v506_v17 = vld [vmem:[#allocation2 + $0x1b0] sm:$0xff] }
  0x32   :  { %v142_v16 = vadd.s32 %v140_v10, %v138_v8  ;;  %v508_v10 = vld [vmem:[#allocation2 + $0x1c0] sm:$0xff]  ;;  %545 = vmatpush.msra.mxu1 %v510_v3  ;;  %565 = vmatpush.msra.mxu2 %v479_v4  ;;  %v467_v54 = vld [vmem:[#allocation2 + $0x78] sm:$0xff]  ;;  %v497_v59 = vld [vmem:[#allocation2 + $0x168] sm:$0xff] }
  0x33   :  { %v165_v23 = vadd.s32 %v164_v19, %v154_v11  ;;  %525 = vmatpush.msra.mxu0 %v478_v63  ;;  %v477_v11 = vld [vmem:[#allocation2 + $0xc8] sm:$0xff]  ;;  %585 = vmatpush.msra.mxu3 %v511_v6  ;;  %v475_v19 = vld [vmem:[#allocation2 + $0xb8] sm:$0xff]  ;;  %v462_v60 = vld [vmem:[#allocation2 + $0x50] sm:$0xff] }
  0x34   :  { %v143_v20 = vadd.s32 %v142_v16, %v132_v7  ;;  %v474_v16 = vld [vmem:[#allocation2 + $0xb0] sm:$0xff]  ;;  %546 = vmatpush.msra.mxu1 %v508_v10  ;;  %566 = vmatpush.msra.mxu2 %v477_v11  ;;  %v463_v5 = vld [vmem:[#allocation2 + $0x58] sm:$0xff]  ;;  %v460_v63 = vld [vmem:[#allocation2 + $0x40] sm:$0xff] }
  0x35   :  { %v166_v25 = vadd.s32 %v165_v23, %v156_v18  ;;  %526 = vmatpush.msra.mxu0 %v476_v9  ;;  %586 = vmatpush.msra.mxu3 %v509_v13  ;;  %v495_v62 = vld [vmem:[#allocation2 + $0x158] sm:$0xff]  ;;  %v461_v3 = vld [vmem:[#allocation2 + $0x48] sm:$0xff]  ;;  %v458_v6 = vld [vmem:[#allocation2 + $0x30] sm:$0xff] }
  0x36   :  { %v144_v24 = vadd.s32 %v143_v20, %v134_v15  ;;  %v507_v20 = vld [vmem:[#allocation2 + $0x1b8] sm:$0xff]  ;;  %547 = vmatpush.msra.mxu1 %v506_v17  ;;  %567 = vmatpush.msra.mxu2 %v475_v19  ;;  %v493_v4 = vld [vmem:[#allocation2 + $0x148] sm:$0xff]  ;;  %v456_v10 = vld [vmem:[#allocation2 + $0x20] sm:$0xff] }
  0x37   :  { %v170_v27 = vadd.s32 1, %v166_v25  ;;  %527 = vmatpush.msra.mxu0 %v474_v16  ;;  %587 = vmatpush.msra.mxu3 %v507_v20  ;;  %v491_v9 = vld [vmem:[#allocation2 + $0x138] sm:$0xff]  ;;  %v488_v11 = vld [vmem:[#allocation2 + $0x120] sm:$0xff]  ;;  %v457_v13 = vld [vmem:[#allocation2 + $0x28] sm:$0xff] }
  0x38   :  { %vm169_vm9 = vc.u32 %v144_v24, %v163_v21  ;;  %v168_v12 = vadd.s32 %v163_v21, %v144_v24  ;;  %v486_v16 = vld [vmem:[#allocation2 + $0x110] sm:$0xff]  ;;  %v455_v17 = vld [vmem:[#allocation2 + $0x18] sm:$0xff]  ;;  %v452_v19 = vld [vmem:[#allocation2] sm:$0xff] }
  0x39   :  { %v171_v28 = vsel %vm169_vm9, %v170_v27, %v166_v25  ;;  %v484_v20 = vld [vmem:[#allocation2 + $0x100] sm:$0xff] }
  0x3a   :  { %v172_v29 = vadd.s32 %v171_v28, %v167_v26 }
  0x3c   :  { %v173_v31 = vadd.s32 536870912, %v172_v29 }
  0x3e   :  { %v174_v32 = vshrl.u32 %v173_v31, 30 }
  0x40   :  { %v175_v33 = vshll.u32 %v174_v32, 30  ;;  %v198_v49 = vsub.s32 4, %v174_v32 }
  0x42   :  { %v176_v0 = vsub.s32 %v172_v29, %v175_v33  ;;  %v199_v53 = vsel %vm76_vm12, %v198_v49, %v174_v32  ;;  %v500_v49 = vld [vmem:[#allocation2 + $0x180] sm:$0xff] }
  0x43   :  { %v201_v1 = vsel %vm1520_vm13, 0, %v199_v53  ;;  %v498_v53 = vld [vmem:[#allocation2 + $0x170] sm:$0xff] }
  0x44   :  { %vm177_vm10 = vcmp.lt.s32.totalorder %v176_v0, 0  ;;  %v178_v34 = vsub.s32 0, %v176_v0  ;;  %v218_v18 = vadd.s32 3, %v201_v1  ;;  %v373_v26 = vand.u32 3, %v201_v1  ;;  %v492_v1 = vld [vmem:[#allocation2 + $0x140] sm:$0xff] }
  0x46   :  { %v179_v35 = vsel %vm177_vm10, %v178_v34, %v176_v0  ;;  %v219_v25 = vand.u32 3, %v218_v18  ;;  %vm378_vm15 = vcmp.eq.s32.totalorder %v373_v26, 2  ;;  %vm375_vm2 = vcmp.eq.s32.totalorder %v373_v26, 0  ;;  %v487_v18 = vld [vmem:[#allocation2 + $0x118] sm:$0xff] }
  0x47   :  { %v180_v36 = vclz %v179_v35  ;;  %vm374_vm3 = vcmp.lt.s32.totalorder %v373_v26, 2  ;;  %v635_v26 = vld [vmem:[#allocation2 + $0x2e8] sm:$0xff] }
  0x48   :  { %vm224_vm14 = vcmp.eq.s32.totalorder %v219_v25, 2  ;;  %vm220_vm0 = vcmp.lt.s32.totalorder %v219_v25, 2  ;;  %vm221_vm1 = vcmp.eq.s32.totalorder %v219_v25, 0  ;;  %v634_v25 = vld [vmem:[#allocation2 + $0x2e0] sm:$0xff] }
  0x49   :  { %v1251_v37 = vadd.s32 4294967294, %v180_v36 }
  0x4b   :  { %vm1252_vm11 = vcmp.lt.s32.totalorder %v1251_v37, 0 }
  0x4c   :  { %v183_v38 = vsel %vm1252_vm11, 0, %v1251_v37 }
  0x4d   :  { %v184_v39 = vsub.s32 32, %v183_v38  ;;  %v185_v40 = vshll.u32 %v176_v0, %v183_v38  ;;  %v188_v41 = vsub.s32 4294967266, %v183_v38 }
  0x4f   :  { %v186_v30 = vshrl.u32 %v168_v12, %v184_v39  ;;  %v189_v42 = vadd.s32 127, %v188_v41  ;;  %v1415_v41 = vmov 1  }
  0x51   :  { %v187_v43 = vor.u32 %v186_v30, %v185_v40  ;;  %v190_v44 = vshll.u32 %v189_v42, 23  ;;  %v472_v30 = vld [vmem:[#allocation2 + $0xa0] sm:$0xff] }
  0x52   :  { %v504_v42 = vld [vmem:[#allocation2 + $0x1a0] sm:$0xff]  ;;  %528 = vmatpush.msra.mxu0 %v472_v30 }
  0x53   :  { %v191_v45 = vor.u32 4788187, %v190_v44  ;;  %v194_v46 = vcvt.s32.f32 %v187_v43  ;;  %v473_v43 = vld [vmem:[#allocation2 + $0xa8] sm:$0xff]  ;;  %548 = vmatpush.msra.mxu1 %v504_v42 }
  0x54   :  { %v505_v44 = vld [vmem:[#allocation2 + $0x1a8] sm:$0xff]  ;;  %568 = vmatpush.msra.mxu2 %v473_v43 }
  0x55   :  { %v192_v47 = vand.u32 2147483647, %v191_v45  ;;  %v502_v45 = vld [vmem:[#allocation2 + $0x190] sm:$0xff]  ;;  %588 = vmatpush.msra.mxu3 %v505_v44  ;;  %v663_v43 = vld [vmem:[#allocation2 + $0x3c8] sm:$0xff] }
  0x56   :  { %549 = vmatpush.msra.mxu1 %v502_v45  ;;  %v660_v44 = vld [vmem:[#allocation2 + $0x3b0] sm:$0xff]  ;;  %v625_v45 = vld [vmem:[#allocation2 + $0x298] sm:$0xff] }
  0x57   :  { %v195_v48 = vmul.f32 %v194_v46, %v192_v47  ;;  %v471_v46 = vld [vmem:[#allocation2 + $0x98] sm:$0xff] }
  0x58   :  { %v503_v47 = vld [vmem:[#allocation2 + $0x198] sm:$0xff]  ;;  %569 = vmatpush.msra.mxu2 %v471_v46  ;;  %550 = vmatpush.msra.mxu1 %v500_v49 }
  0x59   :  { %v196_v51 = vxor.u32 2147483648, %v195_v48  ;;  %589 = vmatpush.msra.mxu3 %v503_v47 }
  0x5a   :  { %570 = vmatpush.msra.mxu2 %v469_v50  ;;  %551 = vmatpush.msra.mxu1 %v498_v53  ;;  %v661_v50 = vld [vmem:[#allocation2 + $0x3b8] sm:$0xff] }
  0x5b   :  { %v197_v52 = vsel %vm76_vm12, %v196_v51, %v195_v48  ;;  %v468_v48 = vld [vmem:[#allocation2 + $0x80] sm:$0xff]  ;;  %v501_v51 = vld [vmem:[#allocation2 + $0x188] sm:$0xff] }
  0x5c   :  { %v200_v57 = vsel %vm1520_vm13, %v1472_v2, %v197_v52  ;;  %v470_v2 = vld [vmem:[#allocation2 + $0x90] sm:$0xff]  ;;  %590 = vmatpush.msra.mxu3 %v501_v51  ;;  %571 = vmatpush.msra.mxu2 %v467_v54  ;;  %v658_v51 = vld [vmem:[#allocation2 + $0x3a0] sm:$0xff] }
  0x5d   :  { %v202_v61 = vmul.f32 %v200_v57, %v200_v57  ;;  %529 = vmatpush.msra.mxu0 %v470_v2  ;;  %v466_v52 = vld [vmem:[#allocation2 + $0x70] sm:$0xff] }
  0x5e   :  { %591 = vmatpush.msra.mxu3 %v499_v55  ;;  %572 = vmatpush.msra.mxu2 %v465_v58  ;;  %v624_v2 = vld [vmem:[#allocation2 + $0x290] sm:$0xff]  ;;  %v622_v55 = vld [vmem:[#allocation2 + $0x280] sm:$0xff]  ;;  %v659_v58 = vld [vmem:[#allocation2 + $0x3a8] sm:$0xff] }
  0x5f   :  { %v203_v7 = vmul.f32 -0.001358992, %v202_v61  ;;  %v210_v8 = vmul.f32 -0.00019511016, %v202_v61  ;;  %530 = vmatpush.msra.mxu0 %v468_v48 }
  0x60   :  { %592 = vmatpush.msra.mxu3 %v497_v59  ;;  %573 = vmatpush.msra.mxu2 %v463_v5  ;;  %v656_v59 = vld [vmem:[#allocation2 + $0x390] sm:$0xff] }
  0x61   :  { %v204_v14 = vadd.f32 0.041655596, %v203_v7  ;;  %v211_v15 = vadd.f32 0.008332121, %v210_v8  ;;  %531 = vmatpush.msra.mxu0 %v466_v52  ;;  %v490_v7 = vld [vmem:[#allocation2 + $0x130] sm:$0xff]  ;;  %v459_v8 = vld [vmem:[#allocation2 + $0x38] sm:$0xff] }
  0x62   :  { %593 = vmatpush.msra.mxu3 %v495_v62  ;;  %574 = vmatpush.msra.mxu2 %v461_v3  ;;  %v657_v3 = vld [vmem:[#allocation2 + $0x398] sm:$0xff] }
  0x63   :  { %v205_v21 = vmul.f32 %v204_v14, %v202_v61  ;;  %v212_v22 = vmul.f32 %v211_v15, %v202_v61  ;;  %532 = vmatpush.msra.mxu0 %v464_v56  ;;  %v489_v14 = vld [vmem:[#allocation2 + $0x128] sm:$0xff]  ;;  %v454_v15 = vld [vmem:[#allocation2 + $0x10] sm:$0xff] }
  0x64   :  { %594 = vmatpush.msra.mxu3 %v493_v4  ;;  %575 = vmatpush.msra.mxu2 %v459_v8  ;;  %v623_v56 = vld [vmem:[#allocation2 + $0x288] sm:$0xff]  ;;  %v654_v4 = vld [vmem:[#allocation2 + $0x380] sm:$0xff] }
  0x65   :  { %v206_v23 = vadd.f32 -0.4999988, %v205_v21  ;;  %v213_v24 = vadd.f32 -0.16666654, %v212_v22  ;;  %533 = vmatpush.msra.mxu0 %v462_v60  ;;  %v453_v21 = vld [vmem:[#allocation2 + $0x8] sm:$0xff]  ;;  %v620_v60 = vld [vmem:[#allocation2 + $0x270] sm:$0xff] }
  0x66   :  { %595 = vmatpush.msra.mxu3 %v491_v9  ;;  %576 = vmatpush.msra.mxu2 %v457_v13  ;;  %v485_v22 = vld [vmem:[#allocation2 + $0x108] sm:$0xff]  ;;  %v618_v9 = vld [vmem:[#allocation2 + $0x260] sm:$0xff] }
  0x67   :  { %v207_v27 = vmul.f32 %v206_v23, %v202_v61  ;;  %v214_v28 = vmul.f32 %v213_v24, %v202_v61  ;;  %v494_v61 = vld [vmem:[#allocation2 + $0x150] sm:$0xff]  ;;  %534 = vmatpush.msra.mxu0 %v460_v63  ;;  %v637_v24 = vld [vmem:[#allocation2 + $0x2f8] sm:$0xff]  ;;  %v655_v13 = vld [vmem:[#allocation2 + $0x388] sm:$0xff] }
  0x68   :  { %596 = vmatpush.msra.mxu3 %v489_v14  ;;  %577 = vmatpush.msra.mxu2 %v455_v17  ;;  %v636_v23 = vld [vmem:[#allocation2 + $0x2f0] sm:$0xff] }
  0x69   :  { %v208_v29 = vadd.f32 1.0, %v207_v27  ;;  %v215_v31 = vadd.f32 1.0, %v214_v28  ;;  %535 = vmatpush.msra.mxu0 %v458_v6  ;;  %v632_v27 = vld [vmem:[#allocation2 + $0x2d0] sm:$0xff]  ;;  %v633_v28 = vld [vmem:[#allocation2 + $0x2d8] sm:$0xff] }
  0x6a   :  { %597 = vmatpush.msra.mxu3 %v487_v18  ;;  %578 = vmatpush.msra.mxu2 %v453_v21  ;;  %v652_v17 = vld [vmem:[#allocation2 + $0x370] sm:$0xff] }
  0x6b   :  { %v216_v32 = vmul.f32 %v215_v31, %v200_v57  ;;  %v225_v33 = vxor.u32 2147483648, %v208_v29  ;;  %v496_v57 = vld [vmem:[#allocation2 + $0x160] sm:$0xff]  ;;  %536 = vmatpush.msra.mxu0 %v456_v10  ;;  %v669_v31 = vld [vmem:[#allocation2 + $0x3f8] sm:$0xff] }
  0x6c   :  { %552 = vmatpush.msra.mxu1 %v496_v57  ;;  %598 = vmatpush.msra.mxu3 %v485_v22  ;;  %v617_v22 = vld [vmem:[#allocation2 + $0x258] sm:$0xff] }
  0x6d   :  { %v222_v0 = vxor.u32 2147483648, %v216_v32  ;;  %v226_v34 = vsel %vm224_vm14, %v225_v33, %v216_v32  ;;  %v380_v35 = vsel %vm378_vm15, %v225_v33, %v216_v32  ;;  %537 = vmatpush.msra.mxu0 %v454_v15  ;;  %716 = vmatpush.msrb.mxu2 %v637_v24  ;;  %v666_v32 = vld [vmem:[#allocation2 + $0x3e0] sm:$0xff] }
  0x6e   :  { %553 = vmatpush.msra.mxu1 %v494_v61  ;;  %v630_v33 = vld [vmem:[#allocation2 + $0x2c0] sm:$0xff]  ;;  %736 = vmatpush.msrb.mxu3 %v669_v31  ;;  %v621_v61 = vld [vmem:[#allocation2 + $0x278] sm:$0xff] }
  0x6f   :  { %v223_v36 = vsel %vm221_vm1, %v208_v29, %v222_v0  ;;  %v377_v37 = vsel %vm375_vm2, %v208_v29, %v222_v0  ;;  %538 = vmatpush.msra.mxu0 %v452_v19  ;;  %v668_v29 = vld [vmem:[#allocation2 + $0x3f0] sm:$0xff]  ;;  %717 = vmatpush.msrb.mxu2 %v635_v26  ;;  %v631_v0 = vld [vmem:[#allocation2 + $0x2c8] sm:$0xff] }
  0x70   :  { %v227_v12 = vsel %vm220_vm0, %v223_v36, %v226_v34  ;;  %v381_v38 = vsel %vm374_vm3, %v377_v37, %v380_v35  ;;  %554 = vmatpush.msra.mxu1 %v492_v1  ;;  %v667_v34 = vld [vmem:[#allocation2 + $0x3e8] sm:$0xff]  ;;  %v664_v35 = vld [vmem:[#allocation2 + $0x3d0] sm:$0xff]  ;;  %v665_v36 = vld [vmem:[#allocation2 + $0x3d8] sm:$0xff] }
  0x71   :  { %v228_v39 = vsel %vm217_vm4, nan, %v227_v12  ;;  %v382_v40 = vsel %vm217_vm4, nan, %v381_v38  ;;  %676 = vmatpush.msrb.mxu0 %v636_v23  ;;  %718 = vmatpush.msrb.mxu2 %v633_v28  ;;  %v628_v37 = vld [vmem:[#allocation2 + $0x2b0] sm:$0xff]  ;;  %v629_v12 = vld [vmem:[#allocation2 + $0x2b8] sm:$0xff]  ;;  %v662_v38 = vld [vmem:[#allocation2 + $0x3c0] sm:$0xff] }
  0x72   :  { %386 = vperm.xlu0 %1271, %v228_v39   ;;  %414 = vperm.xlu1 %1273, %v382_v40   ;;  %v653_v23 = vld [vmem:[#allocation2 + $0x378] sm:$0xff]  ;;  %v614_v28 = vld [vmem:[#allocation2 + $0x240] sm:$0xff] }
  0x73   :  { %555 = vmatpush.msra.mxu1 %v490_v7  ;;  %677 = vmatpush.msrb.mxu0 %v634_v25 }
  0x74   :  { %737 = vmatpush.msrb.mxu3 %v667_v34  ;;  %719 = vmatpush.msrb.mxu2 %v631_v0 }
  0x75   :  { %556 = vmatpush.msra.mxu1 %v488_v11  ;;  %678 = vmatpush.msrb.mxu0 %v632_v27  ;;  %v619_v11 = vld [vmem:[#allocation2 + $0x268] sm:$0xff]  ;;  %v441_v27 = vld [vmem:[%s1578_s2] sm:$0x3]  ;;  %s1416_s2 = smov [#allocation8]  }
  0x76   :  { %738 = vmatpush.msrb.mxu3 %v665_v36  ;;  %720 = vmatpush.msrb.mxu2 %v629_v12  ;;  %v444_v36 = vperm.slane %v441_v27, 1  ;;  %s1221_s19 = sshll.u32 %s1416_s2, 4  ;;  %s1222_s19 = int_to_ptr.vmem [resolvable:$true] %s1221_s19 }
  0x77   :  { %557 = vmatpush.msra.mxu1 %v486_v16  ;;  %679 = vmatpush.msrb.mxu0 %v630_v33  ;;  %v616_v16 = vld [vmem:[#allocation2 + $0x250] sm:$0xff]  ;;  %v615_v33 = vld [vmem:[#allocation2 + $0x248] sm:$0xff] }
  0x78   :  { %739 = vmatpush.msrb.mxu3 %v663_v43  ;;  %v613_v43 = vld [vmem:[#allocation2 + $0x238] sm:$0xff] }
  0x79   :  { %558 = vmatpush.msra.mxu1 %v484_v20  ;;  %680 = vmatpush.msrb.mxu0 %v628_v37 }
  0x7a   :  { %1272 = vset.pattern.permute.xlu0 %v1415_v41  ;;  %1274 = vset.pattern.permute.xlu1 %v1415_v41  ;;  %v627_v41 = vld [vmem:[#allocation2 + $0x2a8] sm:$0xff] }
  0x7b   :  { %399 = vperm.xlu0 %1272, %v228_v39   ;;  %428 = vperm.xlu1 %1274, %v382_v40   ;;  %v383_v39 = vld [vmem:[%s1577_s1] sm:$0xff] }
  0x7c   :  { %696 = vmatpush.msrb.mxu1 %v668_v29  ;;  %v626_v40 = vld [vmem:[#allocation2 + $0x2a0] sm:$0xff]  ;;  %v390_v46 = vperm.slane %v383_v39, 0  ;;  %v391_v47 = vperm.slane %v383_v39, 4  ;;  %v402_v48 = vperm.slane %v383_v39, 1  ;;  %v403_v49 = vperm.slane %v383_v39, 5  ;;  %721 = vmatpush.msrb.mxu2 %v627_v41 }
  0x7d   :  { %681 = vmatpush.msrb.mxu0 %v626_v40  ;;  %v417_v52 = vperm.slane %v383_v39, 2  ;;  %v418_v53 = vperm.slane %v383_v39, 6  ;;  %v431_v54 = vperm.slane %v383_v39, 3  ;;  %v432_v57 = vperm.slane %v383_v39, 7  ;;  %740 = vmatpush.msrb.mxu3 %v661_v50  ;;  %v609_v50 = vld [vmem:[#allocation2 + $0x218] sm:$0xff] }
  0x7e   :  { %697 = vmatpush.msrb.mxu1 %v666_v32  ;;  %722 = vmatpush.msrb.mxu2 %v625_v45  ;;  %v394_v5 = vperm.slane %v390_v46, 0  ;;  %v395_v62 = vperm.slane %v391_v47, 0  ;;  %v406_v63 = vperm.slane %v402_v48, 1  ;;  %v407_v1 = vperm.slane %v403_v49, 1  ;;  %v648_v45 = vld [vmem:[#allocation2 + $0x350] sm:$0xff]  ;;  %v611_v46 = vld [vmem:[#allocation2 + $0x228] sm:$0xff] }
  0x7f   :  { %682 = vmatpush.msrb.mxu0 %v624_v2  ;;  %v421_v6 = vperm.slane %v417_v52, 2  ;;  %v422_v7 = vperm.slane %v418_v53, 2  ;;  %v435_v8 = vperm.slane %v431_v54, 3  ;;  %741 = vmatpush.msrb.mxu3 %v659_v58  ;;  %v436_v10 = vperm.slane %v432_v57, 3  ;;  %v610_v2 = vld [vmem:[#allocation2 + $0x220] sm:$0xff]  ;;  %v649_v47 = vld [vmem:[#allocation2 + $0x358] sm:$0xff] }
  0x80   :  { %698 = vmatpush.msrb.mxu1 %v664_v35  ;;  %723 = vmatpush.msrb.mxu2 %v623_v56  ;;  %v443_v35 = vperm.slane %v441_v27, 0  ;;  %v608_v48 = vld [vmem:[#allocation2 + $0x210] sm:$0xff]  ;;  %v646_v49 = vld [vmem:[#allocation2 + $0x340] sm:$0xff]  ;;  %v607_v54 = vld [vmem:[#allocation2 + $0x208] sm:$0xff] }
  0x81   :  { %683 = vmatpush.msrb.mxu0 %v622_v55  ;;  %742 = vmatpush.msrb.mxu3 %v657_v3  ;;  %v606_v52 = vld [vmem:[#allocation2 + $0x200] sm:$0xff]  ;;  %v644_v53 = vld [vmem:[#allocation2 + $0x330] sm:$0xff]  ;;  %v645_v55 = vld [vmem:[#allocation2 + $0x338] sm:$0xff] }
  0x82   :  { %699 = vmatpush.msrb.mxu1 %v662_v38  ;;  %724 = vmatpush.msrb.mxu2 %v621_v61  ;;  %v642_v56 = vld [vmem:[#allocation2 + $0x320] sm:$0xff]  ;;  %v643_v57 = vld [vmem:[#allocation2 + $0x328] sm:$0xff]  ;;  %v640_v58 = vld [vmem:[#allocation2 + $0x310] sm:$0xff] }
  0x83   :  { %684 = vmatpush.msrb.mxu0 %v620_v60  ;;  %743 = vmatpush.msrb.mxu3 %v655_v13  ;;  %v638_v60 = vld [vmem:[#allocation2 + $0x300] sm:$0xff]  ;;  %v639_v61 = vld [vmem:[#allocation2 + $0x308] sm:$0xff]  ;;  %v787_v3 = vld [vmem:[#allocation2 + $0x4d0] sm:$0xff] }
  0x84   :  { %700 = vmatpush.msrb.mxu1 %v660_v44  ;;  %725 = vmatpush.msrb.mxu2 %v619_v11  ;;  %v651_v44 = vld [vmem:[#allocation2 + $0x368] sm:$0xff]  ;;  %v819_v13 = vld [vmem:[#allocation2 + $0x5d0] sm:$0xff]  ;;  %v813_v27 = vld [vmem:[#allocation2 + $0x5a0] sm:$0xff] }
  0x85   :  { %685 = vmatpush.msrb.mxu0 %v618_v9  ;;  %744 = vmatpush.msrb.mxu3 %v653_v23  ;;  %v785_v9 = vld [vmem:[#allocation2 + $0x4c0] sm:$0xff]  ;;  %v822_v11 = vld [vmem:[#allocation2 + $0x5e8] sm:$0xff]  ;;  %v816_v23 = vld [vmem:[#allocation2 + $0x5b8] sm:$0xff] }
  0x86   :  { %701 = vmatpush.msrb.mxu1 %v658_v51  ;;  %726 = vmatpush.msrb.mxu2 %v617_v22  ;;  %v647_v51 = vld [vmem:[#allocation2 + $0x348] sm:$0xff]  ;;  %v815_v22 = vld [vmem:[#allocation2 + $0x5b0] sm:$0xff] }
  0x87   :  { %686 = vmatpush.msrb.mxu0 %v616_v16  ;;  %745 = vmatpush.msrb.mxu3 %v651_v44  ;;  %v784_v16 = vld [vmem:[#allocation2 + $0x4b8] sm:$0xff] }
  0x88   :  { %702 = vmatpush.msrb.mxu1 %v656_v59  ;;  %727 = vmatpush.msrb.mxu2 %v615_v33  ;;  %v641_v59 = vld [vmem:[#allocation2 + $0x318] sm:$0xff] }
  0x89   :  { %687 = vmatpush.msrb.mxu0 %v614_v28  ;;  %746 = vmatpush.msrb.mxu3 %v649_v47  ;;  %v814_v28 = vld [vmem:[#allocation2 + $0x5a8] sm:$0xff]  ;;  %v776_v33 = vld [vmem:[#allocation2 + $0x478] sm:$0xff] }
  0x8a   :  { %703 = vmatpush.msrb.mxu1 %v654_v4  ;;  %728 = vmatpush.msrb.mxu2 %v613_v43  ;;  %v788_v4 = vld [vmem:[#allocation2 + $0x4d8] sm:$0xff]  ;;  %v774_v47 = vld [vmem:[#allocation2 + $0x468] sm:$0xff] }
  0x8b   :  { %747 = vmatpush.msrb.mxu3 %v647_v51  ;;  %v772_v51 = vld [vmem:[#allocation2 + $0x458] sm:$0xff] }
  0x8c   :  { %704 = vmatpush.msrb.mxu1 %v652_v17  ;;  %729 = vmatpush.msrb.mxu2 %v611_v46  ;;  %v817_v17 = vld [vmem:[#allocation2 + $0x5c0] sm:$0xff]  ;;  %v811_v46 = vld [vmem:[#allocation2 + $0x590] sm:$0xff] }
  0x8d   :  { %748 = vmatpush.msrb.mxu3 %v645_v55  ;;  %v770_v55 = vld [vmem:[#allocation2 + $0x448] sm:$0xff] }
  0x8e   :  { %730 = vmatpush.msrb.mxu2 %v609_v50  ;;  %v809_v50 = vld [vmem:[#allocation2 + $0x580] sm:$0xff] }
  0x8f   :  { %749 = vmatpush.msrb.mxu3 %v643_v57  ;;  %v767_v57 = vld [vmem:[#allocation2 + $0x430] sm:$0xff] }
  0x90   :  { %731 = vmatpush.msrb.mxu2 %v607_v54  ;;  %v807_v54 = vld [vmem:[#allocation2 + $0x570] sm:$0xff] }
  0x91   :  { %750 = vmatpush.msrb.mxu3 %v641_v59  ;;  %v768_v59 = vld [vmem:[#allocation2 + $0x438] sm:$0xff] }
  0x93   :  { %751 = vmatpush.msrb.mxu3 %v639_v61  ;;  %v765_v61 = vld [vmem:[#allocation2 + $0x420] sm:$0xff] }
  0xe4   :  { %v387_v30 = vpop.permute.xlu0 %386  ;;  %v1533_v42 = vpop.permute.xlu1 %414 }
  0xe5   :  { %v396_v18 = vmul.f32 %v394_v5, %v387_v30  ;;  %v397_v19 = vmul.f32 %v395_v62, %v387_v30  ;;  %v423_v24 = vmul.f32 %v421_v6, %v1533_v42  ;;  %v424_v25 = vmul.f32 %v422_v7, %v1533_v42  ;;  %v612_v30 = vld [vmem:[#allocation2 + $0x230] sm:$0xff]  ;;  %v650_v42 = vld [vmem:[#allocation2 + $0x360] sm:$0xff]  ;;  %v792_v62 = vld [vmem:[#allocation2 + $0x4f8] sm:$0xff] }
  0xe6   :  { %688 = vmatpush.msrb.mxu0 %v612_v30  ;;  %705 = vmatpush.msrb.mxu1 %v650_v42  ;;  %v791_v5 = vld [vmem:[#allocation2 + $0x4f0] sm:$0xff]  ;;  %v824_v7 = vld [vmem:[#allocation2 + $0x5f8] sm:$0xff] }
  0xe7   :  { %v823_v6 = vld [vmem:[#allocation2 + $0x5f0] sm:$0xff] }
  0xe8   :  { %689 = vmatpush.msrb.mxu0 %v610_v2  ;;  %706 = vmatpush.msrb.mxu1 %v648_v45  ;;  %v773_v45 = vld [vmem:[#allocation2 + $0x460] sm:$0xff] }
  0xea   :  { %690 = vmatpush.msrb.mxu0 %v608_v48  ;;  %707 = vmatpush.msrb.mxu1 %v646_v49  ;;  %v812_v48 = vld [vmem:[#allocation2 + $0x598] sm:$0xff]  ;;  %v771_v49 = vld [vmem:[#allocation2 + $0x450] sm:$0xff] }
  0xec   :  { %691 = vmatpush.msrb.mxu0 %v606_v52  ;;  %708 = vmatpush.msrb.mxu1 %v644_v53  ;;  %v810_v52 = vld [vmem:[#allocation2 + $0x588] sm:$0xff]  ;;  %v769_v53 = vld [vmem:[#allocation2 + $0x440] sm:$0xff] }
  0xed   :  { %v400_v14 = vpop.permute.xlu0 %399  ;;  %v429_v15 = vpop.permute.xlu1 %428 }
  0xee   :  { %v408_v20 = vmul.f32 %v406_v63, %v400_v14  ;;  %v409_v21 = vmul.f32 %v407_v1, %v400_v14  ;;  %v437_v26 = vmul.f32 %v435_v8, %v429_v15  ;;  %v438_v32 = vmul.f32 %v436_v10, %v429_v15  ;;  %709 = vmatpush.msrb.mxu1 %v642_v56  ;;  %v789_v63 = vld [vmem:[#allocation2 + $0x4e0] sm:$0xff]  ;;  %v790_v1 = vld [vmem:[#allocation2 + $0x4e8] sm:$0xff]  ;;  %v820_v14 = vld [vmem:[#allocation2 + $0x5d8] sm:$0xff] }
  0xef   :  { %v821_v8 = vld [vmem:[#allocation2 + $0x5e0] sm:$0xff]  ;;  %v786_v10 = vld [vmem:[#allocation2 + $0x4c8] sm:$0xff]  ;;  %v783_v15 = vld [vmem:[#allocation2 + $0x4b0] sm:$0xff] }
  0xf0   :  { %v410_v29 = vadd.f32 %v408_v20, %v396_v18  ;;  %v411_v31 = vadd.f32 %v409_v21, %v397_v19  ;;  %710 = vmatpush.msrb.mxu1 %v640_v58  ;;  %v818_v18 = vld [vmem:[#allocation2 + $0x5c8] sm:$0xff]  ;;  %v1548_v19 = vld [vmem:[#allocation5] sm:$0xff]  ;;  %v808_v56 = vld [vmem:[#allocation2 + $0x578] sm:$0xff] }
  0xf1   :  { %v781_v20 = vld [vmem:[#allocation2 + $0x4a0] sm:$0xff]  ;;  %v782_v21 = vld [vmem:[#allocation2 + $0x4a8] sm:$0xff] }
  0xf2   :  { %v425_v0 = vadd.f32 %v423_v24, %v410_v29  ;;  %v426_v34 = vadd.f32 %v424_v25, %v411_v31  ;;  %711 = vmatpush.msrb.mxu1 %v638_v60  ;;  %v779_v24 = vld [vmem:[#allocation2 + $0x490] sm:$0xff]  ;;  %v780_v25 = vld [vmem:[#allocation2 + $0x498] sm:$0xff]  ;;  %v777_v29 = vld [vmem:[#allocation2 + $0x480] sm:$0xff] }
  0xf3   :  { %v778_v31 = vld [vmem:[#allocation2 + $0x488] sm:$0xff]  ;;  %v805_v58 = vld [vmem:[#allocation2 + $0x560] sm:$0xff] }
  0xf4   :  { %v439_v37 = vadd.f32 %v437_v26, %v425_v0  ;;  %v440_v12 = vadd.f32 %v438_v32, %v426_v34  ;;  %v517_v26 = vperm.slane %v1548_v19, 0  ;;  %v775_v32 = vld [vmem:[#allocation2 + $0x470] sm:$0xff]  ;;  %v806_v60 = vld [vmem:[#allocation2 + $0x568] sm:$0xff] }
  0xf6   :  { %v447_v38 = vadd.f32 %v443_v35, %v439_v37  ;;  %v448_v39 = vadd.f32 %v444_v36, %v440_v12  ;;  %v521_v0 = vperm.slane %v517_v26, 0  ;;  %v518_v35 = vperm.slane %v1548_v19, 4  ;;  %v977_v26 = vld [vmem:[#allocation2 + $0x7f8] sm:$0xff] }
  0xf8   :  { %v1540_v40 = vmax.f32 %v447_v38, 0.0  ;;  %v1542_v41 = vmax.f32 %v448_v39, 0.0  ;;  %v522_v38 = vperm.slane %v518_v35, 0  ;;  %v970_v35 = vld [vmem:[#allocation2 + $0x7c0] sm:$0xff] }
  0xfa   :  { %539 = vmatmul.f32.vlgmr.msra.gmra.mxu0 %v1540_v40  ;;  %559 = vmatmul.f32.vlgmr.msra.gmra.mxu1 %v1542_v41 }
  0xfb   :  { %579 = vmatmul.f32.vlgmr.msra.gmra.mxu2 %v1540_v40  ;;  %599 = vmatmul.f32.vlgmr.msra.gmra.mxu3 %v1542_v41 }
  0xfc   :  { %831 = vmatpush.msra.mxu0 %v791_v5  ;;  %871 = vmatpush.msra.mxu2 %v792_v62  ;;  %v803_v5 = vld [vmem:[#allocation2 + $0x550] sm:$0xff]  ;;  %v766_v62 = vld [vmem:[#allocation2 + $0x428] sm:$0xff] }
  0xfd   :  { %851 = vmatpush.msra.mxu1 %v823_v6  ;;  %891 = vmatpush.msra.mxu3 %v824_v7  ;;  %v802_v6 = vld [vmem:[#allocation2 + $0x548] sm:$0xff]  ;;  %v761_v7 = vld [vmem:[#allocation2 + $0x400] sm:$0xff] }
  0xfe   :  { %832 = vmatpush.msra.mxu0 %v789_v63  ;;  %872 = vmatpush.msra.mxu2 %v790_v1  ;;  %v804_v63 = vld [vmem:[#allocation2 + $0x558] sm:$0xff]  ;;  %v763_v1 = vld [vmem:[#allocation2 + $0x410] sm:$0xff] }
  0xff   :  { %852 = vmatpush.msra.mxu1 %v821_v8  ;;  %892 = vmatpush.msra.mxu3 %v822_v11  ;;  %v799_v8 = vld [vmem:[#allocation2 + $0x530] sm:$0xff]  ;;  %v797_v11 = vld [vmem:[#allocation2 + $0x520] sm:$0xff] }
 0x100   :  { %833 = vmatpush.msra.mxu0 %v787_v3  ;;  %873 = vmatpush.msra.mxu2 %v788_v4  ;;  %v801_v3 = vld [vmem:[#allocation2 + $0x540] sm:$0xff]  ;;  %v764_v4 = vld [vmem:[#allocation2 + $0x418] sm:$0xff] }
 0x101   :  { %853 = vmatpush.msra.mxu1 %v819_v13  ;;  %893 = vmatpush.msra.mxu3 %v820_v14  ;;  %v798_v13 = vld [vmem:[#allocation2 + $0x528] sm:$0xff]  ;;  %v795_v14 = vld [vmem:[#allocation2 + $0x510] sm:$0xff] }
 0x102   :  { %834 = vmatpush.msra.mxu0 %v785_v9  ;;  %874 = vmatpush.msra.mxu2 %v786_v10  ;;  %v762_v9 = vld [vmem:[#allocation2 + $0x408] sm:$0xff]  ;;  %v800_v10 = vld [vmem:[#allocation2 + $0x538] sm:$0xff] }
 0x103   :  { %854 = vmatpush.msra.mxu1 %v817_v17  ;;  %894 = vmatpush.msra.mxu3 %v818_v18  ;;  %v794_v17 = vld [vmem:[#allocation2 + $0x508] sm:$0xff]  ;;  %v944_v18 = vld [vmem:[#allocation2 + $0x6f0] sm:$0xff] }
 0x104   :  { %835 = vmatpush.msra.mxu0 %v783_v15  ;;  %875 = vmatpush.msra.mxu2 %v784_v16  ;;  %v796_v15 = vld [vmem:[#allocation2 + $0x518] sm:$0xff]  ;;  %v793_v16 = vld [vmem:[#allocation2 + $0x500] sm:$0xff] }
 0x105   :  { %855 = vmatpush.msra.mxu1 %v815_v22  ;;  %895 = vmatpush.msra.mxu3 %v816_v23  ;;  %v943_v22 = vld [vmem:[#allocation2 + $0x6e8] sm:$0xff]  ;;  %v940_v23 = vld [vmem:[#allocation2 + $0x6d0] sm:$0xff] }
 0x106   :  { %836 = vmatpush.msra.mxu0 %v781_v20  ;;  %876 = vmatpush.msra.mxu2 %v782_v21  ;;  %v945_v20 = vld [vmem:[#allocation2 + $0x6f8] sm:$0xff]  ;;  %v942_v21 = vld [vmem:[#allocation2 + $0x6e0] sm:$0xff] }
 0x107   :  { %856 = vmatpush.msra.mxu1 %v813_v27  ;;  %896 = vmatpush.msra.mxu3 %v814_v28  ;;  %v974_v27 = vld [vmem:[#allocation2 + $0x7e0] sm:$0xff] }
 0x108   :  { %837 = vmatpush.msra.mxu0 %v779_v24  ;;  %877 = vmatpush.msra.mxu2 %v780_v25  ;;  %v941_v24 = vld [vmem:[#allocation2 + $0x6d8] sm:$0xff]  ;;  %v976_v25 = vld [vmem:[#allocation2 + $0x7f0] sm:$0xff]  ;;  %v938_v28 = vld [vmem:[#allocation2 + $0x6c0] sm:$0xff] }
 0x109   :  { %857 = vmatpush.msra.mxu1 %v811_v46  ;;  %897 = vmatpush.msra.mxu3 %v812_v48  ;;  %v931_v46 = vld [vmem:[#allocation2 + $0x688] sm:$0xff]  ;;  %v965_v48 = vld [vmem:[#allocation2 + $0x798] sm:$0xff] }
 0x10a   :  { %838 = vmatpush.msra.mxu0 %v777_v29  ;;  %878 = vmatpush.msra.mxu2 %v778_v31  ;;  %v939_v29 = vld [vmem:[#allocation2 + $0x6c8] sm:$0xff] }
 0x10b   :  { %858 = vmatpush.msra.mxu1 %v809_v50  ;;  %898 = vmatpush.msra.mxu3 %v810_v52  ;;  %v975_v31 = vld [vmem:[#allocation2 + $0x7e8] sm:$0xff]  ;;  %v928_v50 = vld [vmem:[#allocation2 + $0x670] sm:$0xff] }
 0x10c   :  { %839 = vmatpush.msra.mxu0 %v775_v32  ;;  %879 = vmatpush.msra.mxu2 %v776_v33  ;;  %v972_v32 = vld [vmem:[#allocation2 + $0x7d0] sm:$0xff]  ;;  %v973_v33 = vld [vmem:[#allocation2 + $0x7d8] sm:$0xff] }
 0x10d   :  { %859 = vmatpush.msra.mxu1 %v807_v54  ;;  %899 = vmatpush.msra.mxu3 %v808_v56  ;;  %v926_v54 = vld [vmem:[#allocation2 + $0x660] sm:$0xff] }
 0x10e   :  { %840 = vmatpush.msra.mxu0 %v773_v45  ;;  %880 = vmatpush.msra.mxu2 %v774_v47  ;;  %v930_v45 = vld [vmem:[#allocation2 + $0x680] sm:$0xff]  ;;  %v964_v47 = vld [vmem:[#allocation2 + $0x790] sm:$0xff] }
 0x10f   :  { %860 = vmatpush.msra.mxu1 %v805_v58  ;;  %900 = vmatpush.msra.mxu3 %v806_v60 }
 0x110   :  { %841 = vmatpush.msra.mxu0 %v771_v49  ;;  %881 = vmatpush.msra.mxu2 %v772_v51  ;;  %v929_v51 = vld [vmem:[#allocation2 + $0x678] sm:$0xff] }
 0x111   :  { %861 = vmatpush.msra.mxu1 %v803_v5  ;;  %901 = vmatpush.msra.mxu3 %v804_v63 }
 0x112   :  { %842 = vmatpush.msra.mxu0 %v769_v53  ;;  %882 = vmatpush.msra.mxu2 %v770_v55  ;;  %v671_v53 = vperm.slane %v1548_v19, 5  ;;  %v927_v55 = vld [vmem:[#allocation2 + $0x668] sm:$0xff] }
 0x113   :  { %862 = vmatpush.msra.mxu1 %v801_v3  ;;  %902 = vmatpush.msra.mxu3 %v802_v6  ;;  %v924_v6 = vld [vmem:[#allocation2 + $0x650] sm:$0xff] }
 0x114   :  { %843 = vmatpush.msra.mxu0 %v767_v57  ;;  %883 = vmatpush.msra.mxu2 %v768_v59  ;;  %v675_v59 = vperm.slane %v671_v53, 1  ;;  %v1090_v53 = vld [vmem:[#allocation7 + $0xa0] sm:$0xff] }
 0x115   :  { %863 = vmatpush.msra.mxu1 %v799_v8  ;;  %903 = vmatpush.msra.mxu3 %v800_v10  ;;  %v925_v8 = vld [vmem:[#allocation2 + $0x658] sm:$0xff]  ;;  %v960_v10 = vld [vmem:[#allocation2 + $0x770] sm:$0xff] }
 0x116   :  { %844 = vmatpush.msra.mxu0 %v765_v61  ;;  %884 = vmatpush.msra.mxu2 %v766_v62 }
 0x117   :  { %864 = vmatpush.msra.mxu1 %v797_v11  ;;  %904 = vmatpush.msra.mxu3 %v798_v13  ;;  %v923_v11 = vld [vmem:[#allocation2 + $0x648] sm:$0xff]  ;;  %v961_v13 = vld [vmem:[#allocation2 + $0x778] sm:$0xff] }
 0x118   :  { %845 = vmatpush.msra.mxu0 %v763_v1  ;;  %885 = vmatpush.msra.mxu2 %v764_v4 }
 0x119   :  { %865 = vmatpush.msra.mxu1 %v795_v14  ;;  %905 = vmatpush.msra.mxu3 %v796_v15  ;;  %v958_v14 = vld [vmem:[#allocation2 + $0x760] sm:$0xff]  ;;  %v921_v15 = vld [vmem:[#allocation2 + $0x638] sm:$0xff] }
 0x11a   :  { %846 = vmatpush.msra.mxu0 %v761_v7  ;;  %886 = vmatpush.msra.mxu2 %v762_v9  ;;  %v962_v7 = vld [vmem:[#allocation2 + $0x780] sm:$0xff] }
 0x11b   :  { %866 = vmatpush.msra.mxu1 %v793_v16  ;;  %906 = vmatpush.msra.mxu3 %v794_v17  ;;  %v922_v9 = vld [vmem:[#allocation2 + $0x640] sm:$0xff]  ;;  %v959_v16 = vld [vmem:[#allocation2 + $0x768] sm:$0xff] }
 0x11c   :  { %v918_v17 = vld [vmem:[#allocation2 + $0x620] sm:$0xff] }
 0x177   :  { %v540_v34 = vpop.f32.mrf.mxu0  ;;  %v560_v37 = vpop.f32.mrf.mxu1 }
 0x178   :  { %v541_v36 = vadd.f32 %v540_v34, %v521_v0  ;;  %v936_v0 = vld [vmem:[#allocation2 + $0x6b0] sm:$0xff]  ;;  %v937_v34 = vld [vmem:[#allocation2 + $0x6b8] sm:$0xff] }
 0x17a   :  { %v561_v12 = vadd.f32 %v560_v37, %v541_v36  ;;  %v971_v36 = vld [vmem:[#allocation2 + $0x7c8] sm:$0xff]  ;;  %v934_v37 = vld [vmem:[#allocation2 + $0x6a0] sm:$0xff] }
 0x17c   :  { %v603_v39 = vmax.f32 %v561_v12, 0.0  ;;  %v935_v12 = vld [vmem:[#allocation2 + $0x6a8] sm:$0xff] }
 0x17e   :  { %v580_v30 = vpop.f32.mrf.mxu2  ;;  %692 = vmatmul.f32.vlgmr.msrb.gmra.mxu0 %v603_v39  ;;  %732 = vmatmul.f32.vlgmr.msrb.gmra.mxu2 %v603_v39  ;;  %v600_v43 = vpop.f32.mrf.mxu3  ;;  %v969_v39 = vld [vmem:[#allocation2 + $0x7b8] sm:$0xff] }
 0x17f   :  { %v581_v42 = vadd.f32 %v580_v30, %v522_v38  ;;  %984 = vmatpush.msrb.mxu0 %v944_v18  ;;  %1024 = vmatpush.msrb.mxu2 %v945_v20  ;;  %v968_v38 = vld [vmem:[#allocation2 + $0x7b0] sm:$0xff]  ;;  %v670_v30 = vperm.slane %v1548_v19, 1  ;;  %v919_v20 = vld [vmem:[#allocation2 + $0x628] sm:$0xff] }
 0x180   :  { %v956_v18 = vld [vmem:[#allocation2 + $0x750] sm:$0xff] }
 0x181   :  { %v601_v44 = vadd.f32 %v600_v43, %v581_v42  ;;  %985 = vmatpush.msrb.mxu0 %v942_v21  ;;  %1025 = vmatpush.msrb.mxu2 %v943_v22  ;;  %v932_v42 = vld [vmem:[#allocation2 + $0x690] sm:$0xff]  ;;  %v933_v43 = vld [vmem:[#allocation2 + $0x698] sm:$0xff]  ;;  %v674_v49 = vperm.slane %v670_v30, 1  ;;  %v1097_v30 = vld [vmem:[#allocation7 + $0xd8] sm:$0xff] }
 0x182   :  { %v957_v21 = vld [vmem:[#allocation2 + $0x758] sm:$0xff]  ;;  %v916_v22 = vld [vmem:[#allocation2 + $0x610] sm:$0xff] }
 0x183   :  { %v604_v2 = vmax.f32 %v601_v44, 0.0  ;;  %986 = vmatpush.msrb.mxu0 %v940_v23  ;;  %1026 = vmatpush.msrb.mxu2 %v941_v24  ;;  %v966_v44 = vld [vmem:[#allocation2 + $0x7a0] sm:$0xff]  ;;  %v917_v24 = vld [vmem:[#allocation2 + $0x618] sm:$0xff] }
 0x184   :  { %v954_v23 = vld [vmem:[#allocation2 + $0x740] sm:$0xff] }
 0x185   :  { %712 = vmatmul.f32.vlgmr.msrb.gmra.mxu1 %v604_v2  ;;  %752 = vmatmul.f32.vlgmr.msrb.gmra.mxu3 %v604_v2  ;;  %v967_v2 = vld [vmem:[#allocation2 + $0x7a8] sm:$0xff] }
 0x186   :  { %1004 = vmatpush.msrb.mxu1 %v976_v25  ;;  %1044 = vmatpush.msrb.mxu3 %v977_v26  ;;  %v955_v25 = vld [vmem:[#allocation2 + $0x748] sm:$0xff]  ;;  %v914_v26 = vld [vmem:[#allocation2 + $0x600] sm:$0xff] }
 0x187   :  { %987 = vmatpush.msrb.mxu0 %v938_v28  ;;  %1027 = vmatpush.msrb.mxu2 %v939_v29  ;;  %v915_v28 = vld [vmem:[#allocation2 + $0x608] sm:$0xff]  ;;  %v953_v29 = vld [vmem:[#allocation2 + $0x738] sm:$0xff] }
 0x188   :  { %1005 = vmatpush.msrb.mxu1 %v974_v27  ;;  %1045 = vmatpush.msrb.mxu3 %v975_v31  ;;  %v952_v27 = vld [vmem:[#allocation2 + $0x730] sm:$0xff]  ;;  %v950_v31 = vld [vmem:[#allocation2 + $0x720] sm:$0xff] }
 0x189   :  { %988 = vmatpush.msrb.mxu0 %v936_v0  ;;  %1028 = vmatpush.msrb.mxu2 %v937_v34  ;;  %v949_v0 = vld [vmem:[#allocation2 + $0x718] sm:$0xff]  ;;  %v946_v34 = vld [vmem:[#allocation2 + $0x700] sm:$0xff] }
 0x18a   :  { %1006 = vmatpush.msrb.mxu1 %v972_v32  ;;  %1046 = vmatpush.msrb.mxu3 %v973_v33  ;;  %v951_v32 = vld [vmem:[#allocation2 + $0x728] sm:$0xff]  ;;  %v948_v33 = vld [vmem:[#allocation2 + $0x710] sm:$0xff] }
 0x18b   :  { %989 = vmatpush.msrb.mxu0 %v934_v37  ;;  %1029 = vmatpush.msrb.mxu2 %v935_v12  ;;  %v1101_v37 = vld [vmem:[#allocation7 + $0xf8] sm:$0xff]  ;;  %v1098_v12 = vld [vmem:[#allocation7 + $0xe0] sm:$0xff] }
 0x18c   :  { %1007 = vmatpush.msrb.mxu1 %v970_v35  ;;  %1047 = vmatpush.msrb.mxu3 %v971_v36  ;;  %v947_v35 = vld [vmem:[#allocation2 + $0x708] sm:$0xff]  ;;  %v1100_v36 = vld [vmem:[#allocation7 + $0xf0] sm:$0xff] }
 0x18d   :  { %990 = vmatpush.msrb.mxu0 %v932_v42  ;;  %1030 = vmatpush.msrb.mxu2 %v933_v43  ;;  %v1132_v42 = vld [vmem:[#allocation7 + $0x1f0] sm:$0xff]  ;;  %v1133_v43 = vld [vmem:[#allocation7 + $0x1f8] sm:$0xff] }
 0x18e   :  { %1008 = vmatpush.msrb.mxu1 %v968_v38  ;;  %1048 = vmatpush.msrb.mxu3 %v969_v39  ;;  %v1099_v38 = vld [vmem:[#allocation7 + $0xe8] sm:$0xff]  ;;  %v1096_v39 = vld [vmem:[#allocation7 + $0xd0] sm:$0xff] }
 0x18f   :  { %991 = vmatpush.msrb.mxu0 %v930_v45  ;;  %1031 = vmatpush.msrb.mxu2 %v931_v46  ;;  %v1095_v45 = vld [vmem:[#allocation7 + $0xc8] sm:$0xff] }
 0x190   :  { %1009 = vmatpush.msrb.mxu1 %v966_v44  ;;  %1049 = vmatpush.msrb.mxu3 %v967_v2  ;;  %v1130_v44 = vld [vmem:[#allocation7 + $0x1e0] sm:$0xff]  ;;  %v1131_v46 = vld [vmem:[#allocation7 + $0x1e8] sm:$0xff] }
 0x191   :  { %992 = vmatpush.msrb.mxu0 %v928_v50  ;;  %1032 = vmatpush.msrb.mxu2 %v929_v51  ;;  %v1094_v2 = vld [vmem:[#allocation7 + $0xc0] sm:$0xff]  ;;  %v1093_v50 = vld [vmem:[#allocation7 + $0xb8] sm:$0xff] }
 0x192   :  { %1010 = vmatpush.msrb.mxu1 %v964_v47  ;;  %1050 = vmatpush.msrb.mxu3 %v965_v48  ;;  %v1128_v47 = vld [vmem:[#allocation7 + $0x1d0] sm:$0xff]  ;;  %v1129_v48 = vld [vmem:[#allocation7 + $0x1d8] sm:$0xff]  ;;  %v1126_v51 = vld [vmem:[#allocation7 + $0x1c0] sm:$0xff] }
 0x193   :  { %993 = vmatpush.msrb.mxu0 %v926_v54  ;;  %1033 = vmatpush.msrb.mxu2 %v927_v55  ;;  %v1091_v54 = vld [vmem:[#allocation7 + $0xa8] sm:$0xff]  ;;  %v1124_v55 = vld [vmem:[#allocation7 + $0x1b0] sm:$0xff] }
 0x194   :  { %1011 = vmatpush.msrb.mxu1 %v962_v7 }
 0x195   :  { %994 = vmatpush.msrb.mxu0 %v924_v6  ;;  %1034 = vmatpush.msrb.mxu2 %v925_v8  ;;  %v826_v8 = vperm.slane %v1548_v19, 6 }
 0x196   :  { %1012 = vmatpush.msrb.mxu1 %v960_v10 }
 0x197   :  { %995 = vmatpush.msrb.mxu0 %v922_v9  ;;  %1035 = vmatpush.msrb.mxu2 %v923_v11  ;;  %v830_v11 = vperm.slane %v826_v8, 2 }
 0x198   :  { %1013 = vmatpush.msrb.mxu1 %v958_v14 }
 0x199   :  { %1036 = vmatpush.msrb.mxu2 %v921_v15 }
 0x19a   :  { %1014 = vmatpush.msrb.mxu1 %v956_v18  ;;  %v1082_v18 = vld [vmem:[#allocation7 + $0x60] sm:$0xff] }
 0x19b   :  { %1037 = vmatpush.msrb.mxu2 %v919_v20  ;;  %v1120_v20 = vld [vmem:[#allocation7 + $0x190] sm:$0xff] }
 0x19c   :  { %1015 = vmatpush.msrb.mxu1 %v954_v23  ;;  %v1080_v23 = vld [vmem:[#allocation7 + $0x50] sm:$0xff] }
 0x19d   :  { %1038 = vmatpush.msrb.mxu2 %v917_v24  ;;  %v1118_v24 = vld [vmem:[#allocation7 + $0x180] sm:$0xff] }
 0x19e   :  { %1016 = vmatpush.msrb.mxu1 %v952_v27  ;;  %v1078_v27 = vld [vmem:[#allocation7 + $0x40] sm:$0xff] }
 0x19f   :  { %1039 = vmatpush.msrb.mxu2 %v915_v28  ;;  %v1116_v28 = vld [vmem:[#allocation7 + $0x170] sm:$0xff] }
 0x1a0   :  { %1017 = vmatpush.msrb.mxu1 %v950_v31  ;;  %v1117_v31 = vld [vmem:[#allocation7 + $0x178] sm:$0xff] }
 0x1a2   :  { %1018 = vmatpush.msrb.mxu1 %v948_v33  ;;  %v1114_v33 = vld [vmem:[#allocation7 + $0x160] sm:$0xff] }
 0x1a4   :  { %1019 = vmatpush.msrb.mxu1 %v946_v34  ;;  %v1115_v34 = vld [vmem:[#allocation7 + $0x168] sm:$0xff] }
 0x1fb   :  { %v693_v52 = vpop.f32.mrf.mxu0 }
 0x1fc   :  { %v694_v56 = vadd.f32 %v693_v52, %v674_v49  ;;  %v1092_v49 = vld [vmem:[#allocation7 + $0xb0] sm:$0xff]  ;;  %v1127_v52 = vld [vmem:[#allocation7 + $0x1c8] sm:$0xff] }
 0x201   :  { %v733_v60 = vpop.f32.mrf.mxu2 }
 0x202   :  { %v713_v57 = vpop.f32.mrf.mxu1  ;;  %v734_v62 = vadd.f32 %v733_v60, %v675_v59  ;;  %v1122_v59 = vld [vmem:[#allocation7 + $0x1a0] sm:$0xff]  ;;  %v1123_v60 = vld [vmem:[#allocation7 + $0x1a8] sm:$0xff] }
 0x203   :  { %v714_v58 = vadd.f32 %v713_v57, %v694_v56  ;;  %v1125_v56 = vld [vmem:[#allocation7 + $0x1b8] sm:$0xff]  ;;  %v1088_v57 = vld [vmem:[#allocation7 + $0x90] sm:$0xff] }
 0x205   :  { %v756_v61 = vmax.f32 %v714_v58, 0.0  ;;  %v1089_v58 = vld [vmem:[#allocation7 + $0x98] sm:$0xff] }
 0x207   :  { %v1555_v5 = vadd.f32 %v756_v61, %v1540_v40  ;;  %v963_v40 = vld [vmem:[#allocation2 + $0x788] sm:$0xff]  ;;  %v825_v61 = vperm.slane %v1548_v19, 2 }
 0x208   :  { %v753_v63 = vpop.f32.mrf.mxu3  ;;  %1051 = vmatpush.msrb.mxu3 %v963_v40 }
 0x209   :  { %v754_v1 = vadd.f32 %v753_v63, %v734_v62  ;;  %847 = vmatmul.f32.vlgmr.msra.gmra.mxu0 %v1555_v5  ;;  %887 = vmatmul.f32.vlgmr.msra.gmra.mxu2 %v1555_v5  ;;  %v1086_v62 = vld [vmem:[#allocation7 + $0x80] sm:$0xff]  ;;  %v1087_v63 = vld [vmem:[#allocation7 + $0x88] sm:$0xff]  ;;  %v829_v6 = vperm.slane %v825_v61, 2 }
 0x20a   :  { %1052 = vmatpush.msrb.mxu3 %v961_v13  ;;  %1174 = vmatpush.msra.mxu2 %v1101_v37  ;;  %v1075_v37 = vld [vmem:[#allocation7 + $0x28] sm:$0xff] }
 0x20b   :  { %v757_v3 = vmax.f32 %v754_v1, 0.0  ;;  %v1084_v1 = vld [vmem:[#allocation7 + $0x70] sm:$0xff] }
 0x20c   :  { %1053 = vmatpush.msrb.mxu3 %v959_v16  ;;  %1175 = vmatpush.msra.mxu2 %v1099_v38  ;;  %v1072_v38 = vld [vmem:[#allocation7 + $0x10] sm:$0xff] }
 0x20d   :  { %v1560_v4 = vadd.f32 %v757_v3, %v1542_v41  ;;  %v920_v41 = vld [vmem:[#allocation2 + $0x630] sm:$0xff]  ;;  %v1085_v3 = vld [vmem:[#allocation7 + $0x78] sm:$0xff] }
 0x20e   :  { %996 = vmatpush.msrb.mxu0 %v920_v41  ;;  %1054 = vmatpush.msrb.mxu3 %v957_v21  ;;  %v1083_v21 = vld [vmem:[#allocation7 + $0x68] sm:$0xff] }
 0x20f   :  { %867 = vmatmul.f32.vlgmr.msra.gmra.mxu1 %v1560_v4  ;;  %907 = vmatmul.f32.vlgmr.msra.gmra.mxu3 %v1560_v4 }
 0x210   :  { %997 = vmatpush.msrb.mxu0 %v918_v17  ;;  %1055 = vmatpush.msrb.mxu3 %v955_v25  ;;  %v1081_v25 = vld [vmem:[#allocation7 + $0x58] sm:$0xff] }
 0x211   :  { %1154 = vmatpush.msra.mxu1 %v1132_v42  ;;  %1176 = vmatpush.msra.mxu2 %v1097_v30  ;;  %v1073_v30 = vld [vmem:[#allocation7 + $0x18] sm:$0xff]  ;;  %v1111_v42 = vld [vmem:[#allocation7 + $0x148] sm:$0xff] }
 0x212   :  { %998 = vmatpush.msrb.mxu0 %v916_v22  ;;  %1056 = vmatpush.msrb.mxu3 %v953_v29  ;;  %v1121_v22 = vld [vmem:[#allocation7 + $0x198] sm:$0xff]  ;;  %v1079_v29 = vld [vmem:[#allocation7 + $0x48] sm:$0xff] }
 0x213   :  { %1155 = vmatpush.msra.mxu1 %v1130_v44  ;;  %1177 = vmatpush.msra.mxu2 %v1095_v45  ;;  %v1108_v44 = vld [vmem:[#allocation7 + $0x130] sm:$0xff]  ;;  %v1109_v45 = vld [vmem:[#allocation7 + $0x138] sm:$0xff] }
 0x214   :  { %999 = vmatpush.msrb.mxu0 %v914_v26  ;;  %1057 = vmatpush.msrb.mxu3 %v951_v32  ;;  %v1119_v26 = vld [vmem:[#allocation7 + $0x188] sm:$0xff]  ;;  %v1076_v32 = vld [vmem:[#allocation7 + $0x30] sm:$0xff] }
 0x215   :  { %1156 = vmatpush.msra.mxu1 %v1128_v47  ;;  %1178 = vmatpush.msra.mxu2 %v1093_v50  ;;  %v1107_v47 = vld [vmem:[#allocation7 + $0x128] sm:$0xff]  ;;  %v1102_v50 = vld [vmem:[#allocation7 + $0x100] sm:$0xff] }
 0x216   :  { %1058 = vmatpush.msrb.mxu3 %v949_v0  ;;  %1134 = vmatpush.msra.mxu0 %v1100_v36  ;;  %v1077_v0 = vld [vmem:[#allocation7 + $0x38] sm:$0xff]  ;;  %v1112_v36 = vld [vmem:[#allocation7 + $0x150] sm:$0xff] }
 0x217   :  { %1157 = vmatpush.msra.mxu1 %v1126_v51  ;;  %1179 = vmatpush.msra.mxu2 %v1091_v54  ;;  %v1103_v51 = vld [vmem:[#allocation7 + $0x108] sm:$0xff] }
 0x218   :  { %1059 = vmatpush.msrb.mxu3 %v947_v35  ;;  %1135 = vmatpush.msra.mxu0 %v1098_v12  ;;  %v1074_v35 = vld [vmem:[#allocation7 + $0x20] sm:$0xff]  ;;  %v1113_v12 = vld [vmem:[#allocation7 + $0x158] sm:$0xff] }
 0x219   :  { %1158 = vmatpush.msra.mxu1 %v1124_v55  ;;  %1180 = vmatpush.msra.mxu2 %v1089_v58  ;;  %v979_v55 = vperm.slane %v1548_v19, 7 }
 0x21a   :  { %1194 = vmatpush.msra.mxu3 %v1133_v43  ;;  %1136 = vmatpush.msra.mxu0 %v1096_v39  ;;  %v1110_v39 = vld [vmem:[#allocation7 + $0x140] sm:$0xff] }
 0x21b   :  { %1159 = vmatpush.msra.mxu1 %v1122_v59  ;;  %1181 = vmatpush.msra.mxu2 %v1087_v63  ;;  %v1070_v43 = vld [vmem:[#allocation7] sm:$0xff]  ;;  %v983_v59 = vperm.slane %v979_v55, 3 }
 0x21c   :  { %1195 = vmatpush.msra.mxu3 %v1131_v46  ;;  %1137 = vmatpush.msra.mxu0 %v1094_v2  ;;  %v1071_v2 = vld [vmem:[#allocation7 + $0x8] sm:$0xff]  ;;  %v1106_v46 = vld [vmem:[#allocation7 + $0x120] sm:$0xff] }
 0x21d   :  { %1182 = vmatpush.msra.mxu2 %v1085_v3  ;;  %1160 = vmatpush.msra.mxu1 %v1120_v20 }
 0x21e   :  { %1196 = vmatpush.msra.mxu3 %v1129_v48  ;;  %1138 = vmatpush.msra.mxu0 %v1092_v49  ;;  %v1104_v48 = vld [vmem:[#allocation7 + $0x110] sm:$0xff]  ;;  %v1105_v49 = vld [vmem:[#allocation7 + $0x118] sm:$0xff] }
 0x21f   :  { %1183 = vmatpush.msra.mxu2 %v1083_v21  ;;  %1161 = vmatpush.msra.mxu1 %v1118_v24 }
 0x220   :  { %1197 = vmatpush.msra.mxu3 %v1127_v52  ;;  %1139 = vmatpush.msra.mxu0 %v1090_v53  ;;  %v978_v52 = vperm.slane %v1548_v19, 3 }
 0x221   :  { %1184 = vmatpush.msra.mxu2 %v1081_v25  ;;  %1162 = vmatpush.msra.mxu1 %v1116_v28 }
 0x222   :  { %1198 = vmatpush.msra.mxu3 %v1125_v56  ;;  %1140 = vmatpush.msra.mxu0 %v1088_v57  ;;  %v982_v53 = vperm.slane %v978_v52, 3 }
 0x223   :  { %1185 = vmatpush.msra.mxu2 %v1079_v29  ;;  %1163 = vmatpush.msra.mxu1 %v1114_v33 }
 0x224   :  { %1199 = vmatpush.msra.mxu3 %v1123_v60  ;;  %1141 = vmatpush.msra.mxu0 %v1086_v62 }
 0x225   :  { %1186 = vmatpush.msra.mxu2 %v1077_v0  ;;  %1164 = vmatpush.msra.mxu1 %v1112_v36 }
 0x226   :  { %1142 = vmatpush.msra.mxu0 %v1084_v1  ;;  %1200 = vmatpush.msra.mxu3 %v1121_v22 }
 0x227   :  { %1187 = vmatpush.msra.mxu2 %v1075_v37  ;;  %1165 = vmatpush.msra.mxu1 %v1110_v39 }
 0x228   :  { %1143 = vmatpush.msra.mxu0 %v1082_v18  ;;  %1201 = vmatpush.msra.mxu3 %v1119_v26 }
 0x229   :  { %1188 = vmatpush.msra.mxu2 %v1073_v30  ;;  %1166 = vmatpush.msra.mxu1 %v1108_v44 }
 0x22a   :  { %1144 = vmatpush.msra.mxu0 %v1080_v23  ;;  %1202 = vmatpush.msra.mxu3 %v1117_v31 }
 0x22b   :  { %1189 = vmatpush.msra.mxu2 %v1071_v2  ;;  %1167 = vmatpush.msra.mxu1 %v1106_v46 }
 0x22c   :  { %1145 = vmatpush.msra.mxu0 %v1078_v27  ;;  %1203 = vmatpush.msra.mxu3 %v1115_v34 }
 0x22d   :  { %1168 = vmatpush.msra.mxu1 %v1104_v48 }
 0x22e   :  { %1146 = vmatpush.msra.mxu0 %v1076_v32  ;;  %1204 = vmatpush.msra.mxu3 %v1113_v12 }
 0x22f   :  { %1169 = vmatpush.msra.mxu1 %v1102_v50 }
 0x230   :  { %1147 = vmatpush.msra.mxu0 %v1074_v35  ;;  %1205 = vmatpush.msra.mxu3 %v1111_v42 }
 0x232   :  { %1148 = vmatpush.msra.mxu0 %v1072_v38  ;;  %1206 = vmatpush.msra.mxu3 %v1109_v45 }
 0x234   :  { %1149 = vmatpush.msra.mxu0 %v1070_v43  ;;  %1207 = vmatpush.msra.mxu3 %v1107_v47 }
 0x236   :  { %1208 = vmatpush.msra.mxu3 %v1105_v49 }
 0x238   :  { %1209 = vmatpush.msra.mxu3 %v1103_v51 }
 0x286   :  { %v848_v7 = vpop.f32.mrf.mxu0 }
 0x287   :  { %v849_v40 = vadd.f32 %v848_v7, %v829_v6 }
 0x28c   :  { %v868_v9 = vpop.f32.mrf.mxu1  ;;  %v888_v13 = vpop.f32.mrf.mxu2 }
 0x28d   :  { %v869_v10 = vadd.f32 %v868_v9, %v849_v40  ;;  %v889_v14 = vadd.f32 %v888_v13, %v830_v11 }
 0x28f   :  { %v911_v41 = vmax.f32 %v869_v10, 0.0 }
 0x291   :  { %1000 = vmatmul.f32.vlgmr.msrb.gmra.mxu0 %v911_v41  ;;  %1040 = vmatmul.f32.vlgmr.msrb.gmra.mxu2 %v911_v41 }
 0x292   :  { %v908_v15 = vpop.f32.mrf.mxu3 }
 0x293   :  { %v909_v16 = vadd.f32 %v908_v15, %v889_v14 }
 0x295   :  { %v912_v17 = vmax.f32 %v909_v16, 0.0 }
 0x297   :  { %1020 = vmatmul.f32.vlgmr.msrb.gmra.mxu1 %v912_v17  ;;  %1060 = vmatmul.f32.vlgmr.msrb.gmra.mxu3 %v912_v17 }
 0x30e   :  { %v1001_v54 = vpop.f32.mrf.mxu0 }
 0x30f   :  { %v1002_v56 = vadd.f32 %v1001_v54, %v982_v53 }
 0x314   :  { %v1021_v57 = vpop.f32.mrf.mxu1  ;;  %v1041_v60 = vpop.f32.mrf.mxu2 }
 0x315   :  { %v1022_v58 = vadd.f32 %v1021_v57, %v1002_v56  ;;  %v1042_v63 = vadd.f32 %v1041_v60, %v983_v59 }
 0x317   :  { %v1064_v61 = vmax.f32 %v1022_v58, 0.0 }
 0x319   :  { %v1066_v62 = vadd.f32 %v1064_v61, %v1555_v5 }
 0x31a   :  { %v1061_v1 = vpop.f32.mrf.mxu3 }
 0x31b   :  { %1068 = vst [vmem:[#allocation8] sm:$0xff] %v1066_v62  ;;  %v1062_v3 = vadd.f32 %v1061_v1, %v1042_v63  ;;  %1150 = vmatmul.f32.vlgmr.msra.gmra.mxu0 %v1066_v62  ;;  %1190 = vmatmul.f32.vlgmr.msra.gmra.mxu2 %v1066_v62 }
 0x31d   :  { %v1065_v6 = vmax.f32 %v1062_v3, 0.0 }
 0x31f   :  { %v1067_v7 = vadd.f32 %v1065_v6, %v1560_v4 }
 0x321   :  { %1069 = vst [vmem:[#allocation8 + $0x8] sm:$0xff] %v1067_v7  ;;  %1170 = vmatmul.f32.vlgmr.msra.gmra.mxu1 %v1067_v7  ;;  %1210 = vmatmul.f32.vlgmr.msra.gmra.mxu3 %v1067_v7 }
 0x322   :  { %1226 = dma.vmem_to_hbm [thread:$0]  %s1222_s19, 256, %s1224_s22, [#allocation4]  }
 0x398   :  { %v1151_v19 = vpop.f32.mrf.mxu0 }
 0x39e   :  { %v1171_v5 = vpop.f32.mrf.mxu1  ;;  %v1191_v4 = vpop.f32.mrf.mxu2 }
 0x39f   :  { %v1172_v8 = vadd.f32 %v1171_v5, %v1151_v19 }
 0x3a1   :  { %1214 = vst [vmem:[#allocation9] sm:$0xff] %v1172_v8 }
 0x3a4   :  { %v1211_v40 = vpop.f32.mrf.mxu3 }
 0x3a5   :  { %v1212_v9 = vadd.f32 %v1211_v40, %v1191_v4 }
 0x3a7   :  { %1215 = vst [vmem:[#allocation9 + $0x8] sm:$0xff] %v1212_v9 }
 0x3a8   :  { %1237 = dma.vmem_to_hbm [thread:$0]  %s1233_s24, 256, %s1235_s27, [#allocation10]  }
 0x3a9   :  { %1399 = dma.done.wait [#allocation4], 256  }
 0x3aa   :  { %1400 = vsyncadd [#allocation4], 4294967040 }
 0x3ab   :  { %1401 = dma.done.wait [#allocation10], 256  }
 0x3ac   :  { %1402 = vsyncadd [#allocation10], 4294967040 }
 0x3ad   :  { %1246 = vsyncpa [#allocation3], 1 }
 0x3ae   :  { %1247 = vsyncpa [#allocation6], 1 }
 0x3af   :  { %1248 = vsyncpa [#allocation4], 1 }
 0x3b0   :  { %1249 = vsyncpa [#allocation10], 1 }

</bundles_post_ra>
